<compile_context>
chip_gen: v6e
topology: v6e:2x2x1
jax: 0.10.0
libtpu: 0.0.40
codegen_flags: <defaults>
</compile_context>

<pallas_src>
import functools

import jax
import jax.numpy as jnp
from jax import lax
from jax.experimental import pallas as pl
from jax.experimental.pallas import tpu as pltpu


def _vmem_limit_bytes():
    # Raise the scoped VMEM limit above the conservative default, but keep
    # headroom and never exceed the chip's physical capacity (64 MiB on v7x).
    cap = 64 * 1024 * 1024
    try:
        info = pltpu.get_tpu_info()
        cap = int(getattr(info, "vmem_capacity_bytes", cap))
    except Exception:
        pass
    return int(max(32 * 1024 * 1024,
                   min(cap - 16 * 1024 * 1024, 100 * 1024 * 1024)))


# ---------------------------------------------------------------------------
# Fused conv3x3+ReLU -> conv3x3+ReLU kernel (channels-first, flat spatial).
# ---------------------------------------------------------------------------
def _double_conv_kernel(xf_ref, w1_ref, b1_ref, w2_ref, b2_ref, ml_ref, mr_ref,
                        bp_ref, h1f_ref, *, H, W):
    # xf_ref : (1, Cin, Lf)   bf16   flat input, zero-padded by W+1 each side
    # w1_ref : (Cout, 9*Cin)  bf16   column index = (dy*3+dx)*Cin + c
    # b1_ref : (Cout, 1)      f32
    # w2_ref : (Cout, 9*Cout) bf16
    # b2_ref : (Cout, 1)      f32
    # ml_ref : (1, HW)        bf16   0 where x == 0   (kills dx=0 wraparound)
    # mr_ref : (1, HW)        bf16   0 where x == W-1 (kills dx=2 wraparound)
    # bp_ref : (1, Cout, HW)  f32    before_pool, lane dim = flattened H*W
    # h1f_ref: (Cout, Lf)     bf16   VMEM scratch: re-padded conv1 output
    HW = H * W
    ml = ml_ref[...]
    mr = mr_ref[...]

    def im2col(read_slice):
        # Build the (9*C, HW) patch operand from 9 shifted lane slices of a
        # flat, row-padded image.  Taps are concatenated so the whole conv is
        # a single MXU matmul with K = 9*C.
        parts = []
        for dy in range(3):
            for dx in range(3):
                t = read_slice(dy * W + dx)          # (C, HW)
                if dx == 0:
                    t = t * ml
                elif dx == 2:
                    t = t * mr
                parts.append(t)
        return jnp.concatenate(parts, axis=0)        # (9*C, HW)

    # ---- conv1 + ReLU (single matmul, f32 accumulate) ----
    p1 = im2col(lambda s: xf_ref[0, :, s:s + HW])
    acc1 = jnp.dot(w1_ref[...], p1, preferred_element_type=jnp.float32)
    h1 = jnp.maximum(acc1 + b1_ref[...], 0.0)        # (Cout, HW) f32

    # ---- re-pad conv1 output inside VMEM (never touches HBM) ----
    h1f_ref[...] = jnp.zeros(h1f_ref.shape, h1f_ref.dtype)
    h1f_ref[:, W + 1:W + 1 + HW] = h1.astype(h1f_ref.dtype)

    # ---- conv2 + ReLU ----
    p2 = im2col(lambda s: h1f_ref[:, s:s + HW])
    acc2 = jnp.dot(w2_ref[...], p2, preferred_element_type=jnp.float32)
    bp_ref[0] = jnp.maximum(acc2 + b2_ref[...], 0.0)


def _double_conv(x_nchw, w1m, b1c, w2m, b2c, ml, mr):
    B, Cin, H, W = x_nchw.shape
    Cout = w1m.shape[0]
    HW = H * W
    Lf = HW + 2 * W + 2
    # Flatten spatial (free) and zero-pad one image row + one element per side
    # so every conv tap is a contiguous shifted slice.  Cast to bf16 at the
    # kernel boundary to halve HBM traffic (accumulation stays f32).
    xf = jnp.pad(x_nchw.reshape(B, Cin, HW),
                 ((0, 0), (0, 0), (W + 1, W + 1))).astype(jnp.bfloat16)

    kernel = functools.partial(_double_conv_kernel, H=H, W=W)
    return pl.pallas_call(
        kernel,
        out_shape=jax.ShapeDtypeStruct((B, Cout, HW), jnp.float32),
        grid=(B,),
        in_specs=[
            pl.BlockSpec((1, Cin, Lf), lambda b: (b, 0, 0)),
            pl.BlockSpec((Cout, 9 * Cin), lambda b: (0, 0)),
            pl.BlockSpec((Cout, 1), lambda b: (0, 0)),
            pl.BlockSpec((Cout, 9 * Cout), lambda b: (0, 0)),
            pl.BlockSpec((Cout, 1), lambda b: (0, 0)),
            pl.BlockSpec((1, HW), lambda b: (0, 0)),
            pl.BlockSpec((1, HW), lambda b: (0, 0)),
        ],
        out_specs=pl.BlockSpec((1, Cout, HW), lambda b: (b, 0, 0)),
        scratch_shapes=[pltpu.VMEM((Cout, Lf), jnp.bfloat16)],
        compiler_params=pltpu.CompilerParams(
            dimension_semantics=("parallel",),
            vmem_limit_bytes=_vmem_limit_bytes()),
    )(xf, w1m, b1c, w2m, b2c, ml, mr)


# ---------------------------------------------------------------------------
# 2x2 / stride-2 max pool kernel (NCHW, no HBM window shuffle).
# ---------------------------------------------------------------------------
def _maxpool2x2_kernel(x_ref, se_ref, so_ref, o_ref):
    # x_ref : (1, C, Hh, 2, W) f32  (the size-2 axis = even/odd image rows,
    #                                produced by a free wrapper reshape)
    # se/so : (W, Wh) f32 exact 0/1 selectors for even / odd columns
    # o_ref : (1, C, Hh, Wh) f32
    even = x_ref[0, :, :, 0:1, :]                    # (C, Hh, 1, W)
    odd = x_ref[0, :, :, 1:2, :]
    vmax = jnp.maximum(even, odd)                    # vertical 2-max
    C, Hh, _, W = vmax.shape
    Wh = o_ref.shape[-1]
    v2 = vmax.reshape(C * Hh, W)                     # merge leading dims only
    # Horizontal 2-max + stride-2 downsample as two exact selection matmuls
    # (avoids strided lane loads / minor-dim reshapes).
    pe = jnp.dot(v2, se_ref[...], preferred_element_type=jnp.float32)
    po = jnp.dot(v2, so_ref[...], preferred_element_type=jnp.float32)
    o_ref[0] = jnp.maximum(pe, po).reshape(C, Hh, Wh)


def _maxpool2x2(bp_flat, H, W):
    B, Cout, HW = bp_flat.shape
    Hh, Wh = H // 2, W // 2
    xr = bp_flat.reshape(B, Cout, Hh, 2, W)          # free, contiguous reshape
    cols = jnp.arange(W, dtype=jnp.int32)[:, None]
    outs = jnp.arange(Wh, dtype=jnp.int32)[None, :]
    se = (cols == 2 * outs).astype(jnp.float32)      # picks even columns
    so = (cols == 2 * outs + 1).astype(jnp.float32)  # picks odd columns
    return pl.pallas_call(
        _maxpool2x2_kernel,
        out_shape=jax.ShapeDtypeStruct((B, Cout, Hh, Wh), jnp.float32),
        grid=(B,),
        in_specs=[
            pl.BlockSpec((1, Cout, Hh, 2, W), lambda b: (b, 0, 0, 0, 0)),
            pl.BlockSpec((W, Wh), lambda b: (0, 0)),
            pl.BlockSpec((W, Wh), lambda b: (0, 0)),
        ],
        out_specs=pl.BlockSpec((1, Cout, Hh, Wh), lambda b: (b, 0, 0, 0)),
        compiler_params=pltpu.CompilerParams(
            dimension_semantics=("parallel",),
            vmem_limit_bytes=_vmem_limit_bytes()),
    )(xr, se, so)


# ---------------------------------------------------------------------------
# Public forward: matches DownConv.forward (NCHW in / NCHW out).
# ---------------------------------------------------------------------------
def down_conv_forward(x_nchw, params, pooling=True):
    """Pallas equivalent of DownConv.forward.  Returns (x, before_pool), NCHW."""
    w1, b1, w2, b2 = params["w1"], params["b1"], params["w2"], params["b2"]
    B, Cin, H, W = x_nchw.shape
    Cout = w1.shape[0]
    HW = H * W

    # OIHW -> (Cout, 9*Cin) with column index (dy*3+dx)*Cin + c; bf16 weights.
    w1m = jnp.transpose(w1, (0, 2, 3, 1)).reshape(Cout, 9 * Cin)
    w1m = w1m.astype(jnp.bfloat16)
    w2m = jnp.transpose(w2, (0, 2, 3, 1)).reshape(Cout, 9 * Cout)
    w2m = w2m.astype(jnp.bfloat16)
    b1c = b1.reshape(Cout, 1).astype(jnp.float32)
    b2c = b2.reshape(Cout, 1).astype(jnp.float32)

    # 0/1 masks killing the horizontal wrap-around taps of the flattened image
    # (dx=0 at x==0, dx=2 at x==W-1).
    xpos = jnp.arange(HW, dtype=jnp.int32) % W
    ml = (xpos != 0).astype(jnp.bfloat16).reshape(1, HW)
    mr = (xpos != W - 1).astype(jnp.bfloat16).reshape(1, HW)

    bp_flat = _double_conv(x_nchw, w1m, b1c, w2m, b2c, ml, mr)  # (B,Cout,HW)
    before_pool = bp_flat.reshape(B, Cout, H, W)                # free reshape
    if pooling:
        pooled = _maxpool2x2(bp_flat, H, W)
        return pooled, before_pool
    return before_pool, before_pool


def _reference(x_nchw, params):
    # Pure-JAX f32 reference (matches PyTorch semantics) for validation.
    def conv(x, w, b):
        y = lax.conv_general_dilated(
            x, w, window_strides=(1, 1), padding=((1, 1), (1, 1)),
            dimension_numbers=("NCHW", "OIHW", "NCHW"))
        return jnp.maximum(y + b[None, :, None, None], 0.0)
    h = conv(x_nchw, params["w1"], params["b1"])
    h = conv(h, params["w2"], params["b2"])
    pooled = lax.reduce_window(h, -jnp.inf, lax.max,
                               (1, 1, 2, 2), (1, 1, 2, 2), "VALID")
    return pooled, h


if __name__ == "__main__":
    B, Cin, Cout, H, W = 2, 4, 8, 16, 16
    key = jax.random.PRNGKey(0)
    kx, k1, k2, k3, k4 = jax.random.split(key, 5)
    x = jax.random.normal(kx, (B, Cin, H, W), jnp.float32)
    params = {
        "w1": 0.2 * jax.random.normal(k1, (Cout, Cin, 3, 3), jnp.float32),
        "b1": 0.1 * jax.random.normal(k2, (Cout,), jnp.float32),
        "w2": 0.2 * jax.random.normal(k3, (Cout, Cout, 3, 3), jnp.float32),
        "b2": 0.1 * jax.random.normal(k4, (Cout,), jnp.float32),
    }

    fwd = jax.jit(down_conv_forward)
    pooled, before_pool = fwd(x, params)
    jax.block_until_ready((pooled, before_pool))

    ref_pooled, ref_bp = _reference(x, params)
    assert pooled.shape == (B, Cout, H // 2, W // 2)
    assert before_pool.shape == (B, Cout, H, W)
    # Activations/weights are intentionally fed to the MXU in bf16 (f32
    # accumulation), so compare against the f32 reference at bf16-level
    # tolerance.  Structural bugs (wrong tap/weight ordering) produce O(1)
    # errors and would still trip these checks.
    err_bp = float(jnp.max(jnp.abs(before_pool - ref_bp)))
    err_p = float(jnp.max(jnp.abs(pooled - ref_pooled)))
    assert jnp.allclose(before_pool, ref_bp, atol=1e-1, rtol=1e-1), err_bp
    assert jnp.allclose(pooled, ref_pooled, atol=1e-1, rtol=1e-1), err_p
    print("KERNEL_OK")
</pallas_src>

<mosaic_0001>
module attributes {stable_mosaic.version = 11 : i64} {
  func.func @_double_conv_kernel(%arg0: i32, %arg1: memref<1x4x290xbf16, #tpu.memory_space<vmem>>, %arg2: memref<8x36xbf16, #tpu.memory_space<vmem>>, %arg3: memref<8x1xf32, #tpu.memory_space<vmem>>, %arg4: memref<8x72xbf16, #tpu.memory_space<vmem>>, %arg5: memref<8x1xf32, #tpu.memory_space<vmem>>, %arg6: memref<1x256xbf16, #tpu.memory_space<vmem>>, %arg7: memref<1x256xbf16, #tpu.memory_space<vmem>>, %arg8: memref<1x8x256xf32, #tpu.memory_space<vmem>>, %arg9: memref<8x290xbf16, #tpu.memory_space<vmem>>) attributes {dimension_semantics = [#tpu.dimension_semantics<parallel>], iteration_bounds = array<i64: 2>, scalar_prefetch = 0 : i64, scratch_operands = 1 : i64, tpu.core_type = #tpu.core_type<tc>, window_params = [{transform_indices = @transform_0, window_bounds = array<i64: 1, 4, 290>}, {pipeline_mode = #tpu.pipeline_mode<synchronous>, transform_indices = @transform_1, window_bounds = array<i64: 8, 36>}, {pipeline_mode = #tpu.pipeline_mode<synchronous>, transform_indices = @transform_2, window_bounds = array<i64: 8, 1>}, {pipeline_mode = #tpu.pipeline_mode<synchronous>, transform_indices = @transform_3, window_bounds = array<i64: 8, 72>}, {pipeline_mode = #tpu.pipeline_mode<synchronous>, transform_indices = @transform_4, window_bounds = array<i64: 8, 1>}, {pipeline_mode = #tpu.pipeline_mode<synchronous>, transform_indices = @transform_5, window_bounds = array<i64: 1, 256>}, {pipeline_mode = #tpu.pipeline_mode<synchronous>, transform_indices = @transform_6, window_bounds = array<i64: 1, 256>}, {transform_indices = @transform_7, window_bounds = array<i64: 1, 8, 256>}]} {
    %c0 = arith.constant 0 : index
    %c0_0 = arith.constant 0 : index
    %0 = vector.load %arg6[%c0, %c0_0] : memref<1x256xbf16, #tpu.memory_space<vmem>>, vector<1x256xbf16>
    %c0_1 = arith.constant 0 : index
    %c0_2 = arith.constant 0 : index
    %1 = vector.load %arg7[%c0_1, %c0_2] : memref<1x256xbf16, #tpu.memory_space<vmem>>, vector<1x256xbf16>
    %c0_3 = arith.constant 0 : index
    %c0_4 = arith.constant 0 : index
    %c0_5 = arith.constant 0 : index
    %2 = vector.load %arg1[%c0_3, %c0_4, %c0_5] : memref<1x4x290xbf16, #tpu.memory_space<vmem>>, vector<1x4x256xbf16>
    %3 = vector.shape_cast %2 : vector<1x4x256xbf16> to vector<4x256xbf16>
    %4 = vector.broadcast %0 : vector<1x256xbf16> to vector<4x256xbf16>
    %5 = arith.mulf %3, %4 : vector<4x256xbf16>
    %c0_6 = arith.constant 0 : index
    %c0_7 = arith.constant 0 : index
    %c1 = arith.constant 1 : index
    %6 = vector.load %arg1[%c0_6, %c0_7, %c1] : memref<1x4x290xbf16, #tpu.memory_space<vmem>>, vector<1x4x256xbf16>
    %7 = vector.shape_cast %6 : vector<1x4x256xbf16> to vector<4x256xbf16>
    %c0_8 = arith.constant 0 : index
    %c0_9 = arith.constant 0 : index
    %c2 = arith.constant 2 : index
    %8 = vector.load %arg1[%c0_8, %c0_9, %c2] : memref<1x4x290xbf16, #tpu.memory_space<vmem>>, vector<1x4x256xbf16>
    %9 = vector.shape_cast %8 : vector<1x4x256xbf16> to vector<4x256xbf16>
    %10 = vector.broadcast %1 : vector<1x256xbf16> to vector<4x256xbf16>
    %11 = arith.mulf %9, %10 : vector<4x256xbf16>
    %c0_10 = arith.constant 0 : index
    %c0_11 = arith.constant 0 : index
    %c16 = arith.constant 16 : index
    %12 = vector.load %arg1[%c0_10, %c0_11, %c16] : memref<1x4x290xbf16, #tpu.memory_space<vmem>>, vector<1x4x256xbf16>
    %13 = vector.shape_cast %12 : vector<1x4x256xbf16> to vector<4x256xbf16>
    %14 = vector.broadcast %0 : vector<1x256xbf16> to vector<4x256xbf16>
    %15 = arith.mulf %13, %14 : vector<4x256xbf16>
    %c0_12 = arith.constant 0 : index
    %c0_13 = arith.constant 0 : index
    %c17 = arith.constant 17 : index
    %16 = vector.load %arg1[%c0_12, %c0_13, %c17] : memref<1x4x290xbf16, #tpu.memory_space<vmem>>, vector<1x4x256xbf16>
    %17 = vector.shape_cast %16 : vector<1x4x256xbf16> to vector<4x256xbf16>
    %c0_14 = arith.constant 0 : index
    %c0_15 = arith.constant 0 : index
    %c18 = arith.constant 18 : index
    %18 = vector.load %arg1[%c0_14, %c0_15, %c18] : memref<1x4x290xbf16, #tpu.memory_space<vmem>>, vector<1x4x256xbf16>
    %19 = vector.shape_cast %18 : vector<1x4x256xbf16> to vector<4x256xbf16>
    %20 = vector.broadcast %1 : vector<1x256xbf16> to vector<4x256xbf16>
    %21 = arith.mulf %19, %20 : vector<4x256xbf16>
    %c0_16 = arith.constant 0 : index
    %c0_17 = arith.constant 0 : index
    %c32 = arith.constant 32 : index
    %22 = vector.load %arg1[%c0_16, %c0_17, %c32] : memref<1x4x290xbf16, #tpu.memory_space<vmem>>, vector<1x4x256xbf16>
    %23 = vector.shape_cast %22 : vector<1x4x256xbf16> to vector<4x256xbf16>
    %24 = vector.broadcast %0 : vector<1x256xbf16> to vector<4x256xbf16>
    %25 = arith.mulf %23, %24 : vector<4x256xbf16>
    %c0_18 = arith.constant 0 : index
    %c0_19 = arith.constant 0 : index
    %c33 = arith.constant 33 : index
    %26 = vector.load %arg1[%c0_18, %c0_19, %c33] : memref<1x4x290xbf16, #tpu.memory_space<vmem>>, vector<1x4x256xbf16>
    %27 = vector.shape_cast %26 : vector<1x4x256xbf16> to vector<4x256xbf16>
    %c0_20 = arith.constant 0 : index
    %c0_21 = arith.constant 0 : index
    %c34 = arith.constant 34 : index
    %28 = vector.load %arg1[%c0_20, %c0_21, %c34] : memref<1x4x290xbf16, #tpu.memory_space<vmem>>, vector<1x4x256xbf16>
    %29 = vector.shape_cast %28 : vector<1x4x256xbf16> to vector<4x256xbf16>
    %30 = vector.broadcast %1 : vector<1x256xbf16> to vector<4x256xbf16>
    %31 = arith.mulf %29, %30 : vector<4x256xbf16>
    %32 = tpu.concatenate %5, %7, %11, %15, %17, %21, %25, %27, %31 in 0 : vector<4x256xbf16>, vector<4x256xbf16>, vector<4x256xbf16>, vector<4x256xbf16>, vector<4x256xbf16>, vector<4x256xbf16>, vector<4x256xbf16>, vector<4x256xbf16>, vector<4x256xbf16> -> vector<36x256xbf16>
    %c0_22 = arith.constant 0 : index
    %c0_23 = arith.constant 0 : index
    %33 = vector.load %arg2[%c0_22, %c0_23] : memref<8x36xbf16, #tpu.memory_space<vmem>>, vector<8x36xbf16>
    %cst = arith.constant dense<0.000000e+00> : vector<8x256xf32>
    %34 = tpu.matmul %33, %32, %cst {dimension_numbers = #tpu.dot_dimension_numbers<[1], [0], [0], [1], [0, 0, 1, 1], [], []>} : vector<8x36xbf16>, vector<36x256xbf16>, vector<8x256xf32> -> vector<8x256xf32>
    %c0_24 = arith.constant 0 : index
    %c0_25 = arith.constant 0 : index
    %35 = vector.load %arg3[%c0_24, %c0_25] : memref<8x1xf32, #tpu.memory_space<vmem>>, vector<8x1xf32>
    %36 = vector.broadcast %35 : vector<8x1xf32> to vector<8x256xf32>
    %37 = arith.addf %34, %36 : vector<8x256xf32>
    %cst_26 = arith.constant 0.000000e+00 : f32
    %38 = vector.broadcast %cst_26 : f32 to vector<8x256xf32>
    %39 = arith.maximumf %37, %38 : vector<8x256xf32>
    %cst_27 = arith.constant 0.000000e+00 : bf16
    %40 = vector.broadcast %cst_27 : bf16 to vector<8x290xbf16>
    %c0_28 = arith.constant 0 : index
    %c0_29 = arith.constant 0 : index
    %41 = vector.load %arg9[%c0_28, %c0_29] : memref<8x290xbf16, #tpu.memory_space<vmem>>, vector<8x290xbf16>
    tpu.vector_store %arg9[%c0_28, %c0_29], %40 {strides = array<i32>} : memref<8x290xbf16, #tpu.memory_space<vmem>>, vector<8x290xbf16>,
    %42 = arith.truncf %39 : vector<8x256xf32> to vector<8x256xbf16>
    %c0_30 = arith.constant 0 : index
    %c17_31 = arith.constant 17 : index
    %43 = vector.load %arg9[%c0_30, %c17_31] : memref<8x290xbf16, #tpu.memory_space<vmem>>, vector<8x256xbf16>
    tpu.vector_store %arg9[%c0_30, %c17_31], %42 {strides = array<i32>} : memref<8x290xbf16, #tpu.memory_space<vmem>>, vector<8x256xbf16>,
    %c0_32 = arith.constant 0 : index
    %c0_33 = arith.constant 0 : index
    %44 = vector.load %arg9[%c0_32, %c0_33] : memref<8x290xbf16, #tpu.memory_space<vmem>>, vector<8x256xbf16>
    %45 = vector.broadcast %0 : vector<1x256xbf16> to vector<8x256xbf16>
    %46 = arith.mulf %44, %45 : vector<8x256xbf16>
    %c0_34 = arith.constant 0 : index
    %c1_35 = arith.constant 1 : index
    %47 = vector.load %arg9[%c0_34, %c1_35] : memref<8x290xbf16, #tpu.memory_space<vmem>>, vector<8x256xbf16>
    %c0_36 = arith.constant 0 : index
    %c2_37 = arith.constant 2 : index
    %48 = vector.load %arg9[%c0_36, %c2_37] : memref<8x290xbf16, #tpu.memory_space<vmem>>, vector<8x256xbf16>
    %49 = vector.broadcast %1 : vector<1x256xbf16> to vector<8x256xbf16>
    %50 = arith.mulf %48, %49 : vector<8x256xbf16>
    %c0_38 = arith.constant 0 : index
    %c16_39 = arith.constant 16 : index
    %51 = vector.load %arg9[%c0_38, %c16_39] : memref<8x290xbf16, #tpu.memory_space<vmem>>, vector<8x256xbf16>
    %52 = vector.broadcast %0 : vector<1x256xbf16> to vector<8x256xbf16>
    %53 = arith.mulf %51, %52 : vector<8x256xbf16>
    %c0_40 = arith.constant 0 : index
    %c17_41 = arith.constant 17 : index
    %54 = vector.load %arg9[%c0_40, %c17_41] : memref<8x290xbf16, #tpu.memory_space<vmem>>, vector<8x256xbf16>
    %c0_42 = arith.constant 0 : index
    %c18_43 = arith.constant 18 : index
    %55 = vector.load %arg9[%c0_42, %c18_43] : memref<8x290xbf16, #tpu.memory_space<vmem>>, vector<8x256xbf16>
    %56 = vector.broadcast %1 : vector<1x256xbf16> to vector<8x256xbf16>
    %57 = arith.mulf %55, %56 : vector<8x256xbf16>
    %c0_44 = arith.constant 0 : index
    %c32_45 = arith.constant 32 : index
    %58 = vector.load %arg9[%c0_44, %c32_45] : memref<8x290xbf16, #tpu.memory_space<vmem>>, vector<8x256xbf16>
    %59 = vector.broadcast %0 : vector<1x256xbf16> to vector<8x256xbf16>
    %60 = arith.mulf %58, %59 : vector<8x256xbf16>
    %c0_46 = arith.constant 0 : index
    %c33_47 = arith.constant 33 : index
    %61 = vector.load %arg9[%c0_46, %c33_47] : memref<8x290xbf16, #tpu.memory_space<vmem>>, vector<8x256xbf16>
    %c0_48 = arith.constant 0 : index
    %c34_49 = arith.constant 34 : index
    %62 = vector.load %arg9[%c0_48, %c34_49] : memref<8x290xbf16, #tpu.memory_space<vmem>>, vector<8x256xbf16>
    %63 = vector.broadcast %1 : vector<1x256xbf16> to vector<8x256xbf16>
    %64 = arith.mulf %62, %63 : vector<8x256xbf16>
    %65 = tpu.concatenate %46, %47, %50, %53, %54, %57, %60, %61, %64 in 0 : vector<8x256xbf16>, vector<8x256xbf16>, vector<8x256xbf16>, vector<8x256xbf16>, vector<8x256xbf16>, vector<8x256xbf16>, vector<8x256xbf16>, vector<8x256xbf16>, vector<8x256xbf16> -> vector<72x256xbf16>
    %c0_50 = arith.constant 0 : index
    %c0_51 = arith.constant 0 : index
    %66 = vector.load %arg4[%c0_50, %c0_51] : memref<8x72xbf16, #tpu.memory_space<vmem>>, vector<8x72xbf16>
    %cst_52 = arith.constant dense<0.000000e+00> : vector<8x256xf32>
    %67 = tpu.matmul %66, %65, %cst_52 {dimension_numbers = #tpu.dot_dimension_numbers<[1], [0], [0], [1], [0, 0, 1, 1], [], []>} : vector<8x72xbf16>, vector<72x256xbf16>, vector<8x256xf32> -> vector<8x256xf32>
    %c0_53 = arith.constant 0 : index
    %c0_54 = arith.constant 0 : index
    %68 = vector.load %arg5[%c0_53, %c0_54] : memref<8x1xf32, #tpu.memory_space<vmem>>, vector<8x1xf32>
    %69 = vector.broadcast %68 : vector<8x1xf32> to vector<8x256xf32>
    %70 = arith.addf %67, %69 : vector<8x256xf32>
    %cst_55 = arith.constant 0.000000e+00 : f32
    %71 = vector.broadcast %cst_55 : f32 to vector<8x256xf32>
    %72 = arith.maximumf %70, %71 : vector<8x256xf32>
    %c0_56 = arith.constant 0 : index
    %c0_57 = arith.constant 0 : index
    %c0_58 = arith.constant 0 : index
    %73 = vector.load %arg8[%c0_56, %c0_57, %c0_58] : memref<1x8x256xf32, #tpu.memory_space<vmem>>, vector<1x8x256xf32>
    %74 = vector.shape_cast %73 : vector<1x8x256xf32> to vector<8x256xf32>
    %75 = vector.shape_cast %72 : vector<8x256xf32> to vector<1x8x256xf32>
    tpu.vector_store %arg8[%c0_56, %c0_57, %c0_58], %75 {strides = array<i32>} : memref<1x8x256xf32, #tpu.memory_space<vmem>>, vector<1x8x256xf32>,
    return
  }
  func.func @transform_0(%arg0: i32) -> (i32, i32, i32) {
    %c0_i32 = arith.constant 0 : i32
    %c0_i32_0 = arith.constant 0 : i32
    %c0_i32_1 = arith.constant 0 : i32
    return %arg0, %c0_i32, %c0_i32_0 : i32, i32, i32
  }
  func.func @transform_1(%arg0: i32) -> (i32, i32) {
    %c0_i32 = arith.constant 0 : i32
    %c0_i32_0 = arith.constant 0 : i32
    %c0_i32_1 = arith.constant 0 : i32
    return %c0_i32, %c0_i32_0 : i32, i32
  }
  func.func @transform_2(%arg0: i32) -> (i32, i32) {
    %c0_i32 = arith.constant 0 : i32
    %c0_i32_0 = arith.constant 0 : i32
    %c0_i32_1 = arith.constant 0 : i32
    return %c0_i32, %c0_i32_0 : i32, i32
  }
  func.func @transform_3(%arg0: i32) -> (i32, i32) {
    %c0_i32 = arith.constant 0 : i32
    %c0_i32_0 = arith.constant 0 : i32
    %c0_i32_1 = arith.constant 0 : i32
    return %c0_i32, %c0_i32_0 : i32, i32
  }
  func.func @transform_4(%arg0: i32) -> (i32, i32) {
    %c0_i32 = arith.constant 0 : i32
    %c0_i32_0 = arith.constant 0 : i32
    %c0_i32_1 = arith.constant 0 : i32
    return %c0_i32, %c0_i32_0 : i32, i32
  }
  func.func @transform_5(%arg0: i32) -> (i32, i32) {
    %c0_i32 = arith.constant 0 : i32
    %c0_i32_0 = arith.constant 0 : i32
    %c0_i32_1 = arith.constant 0 : i32
    return %c0_i32, %c0_i32_0 : i32, i32
  }
  func.func @transform_6(%arg0: i32) -> (i32, i32) {
    %c0_i32 = arith.constant 0 : i32
    %c0_i32_0 = arith.constant 0 : i32
    %c0_i32_1 = arith.constant 0 : i32
    return %c0_i32, %c0_i32_0 : i32, i32
  }
  func.func @transform_7(%arg0: i32) -> (i32, i32, i32) {
    %c0_i32 = arith.constant 0 : i32
    %c0_i32_0 = arith.constant 0 : i32
    %c0_i32_1 = arith.constant 0 : i32
    return %arg0, %c0_i32, %c0_i32_0 : i32, i32, i32
  }
}

module attributes {stable_mosaic.version = 11 : i64} {
  func.func @_maxpool2x2_kernel(%arg0: i32, %arg1: memref<1x8x8x2x16xf32, #tpu.memory_space<vmem>>, %arg2: memref<16x8xf32, #tpu.memory_space<vmem>>, %arg3: memref<16x8xf32, #tpu.memory_space<vmem>>, %arg4: memref<1x8x8x8xf32, #tpu.memory_space<vmem>>) attributes {dimension_semantics = [#tpu.dimension_semantics<parallel>], iteration_bounds = array<i64: 2>, scalar_prefetch = 0 : i64, scratch_operands = 0 : i64, tpu.core_type = #tpu.core_type<tc>, window_params = [{transform_indices = @transform_0, window_bounds = array<i64: 1, 8, 8, 2, 16>}, {pipeline_mode = #tpu.pipeline_mode<synchronous>, transform_indices = @transform_1, window_bounds = array<i64: 16, 8>}, {pipeline_mode = #tpu.pipeline_mode<synchronous>, transform_indices = @transform_2, window_bounds = array<i64: 16, 8>}, {transform_indices = @transform_3, window_bounds = array<i64: 1, 8, 8, 8>}]} {
    %c0 = arith.constant 0 : index
    %c0_0 = arith.constant 0 : index
    %c0_1 = arith.constant 0 : index
    %c0_2 = arith.constant 0 : index
    %c0_3 = arith.constant 0 : index
    %0 = vector.load %arg1[%c0, %c0_0, %c0_1, %c0_2, %c0_3] : memref<1x8x8x2x16xf32, #tpu.memory_space<vmem>>, vector<1x8x8x1x16xf32>
    %1 = vector.shape_cast %0 : vector<1x8x8x1x16xf32> to vector<8x8x1x16xf32>
    %c0_4 = arith.constant 0 : index
    %c0_5 = arith.constant 0 : index
    %c0_6 = arith.constant 0 : index
    %c1 = arith.constant 1 : index
    %c0_7 = arith.constant 0 : index
    %2 = vector.load %arg1[%c0_4, %c0_5, %c0_6, %c1, %c0_7] : memref<1x8x8x2x16xf32, #tpu.memory_space<vmem>>, vector<1x8x8x1x16xf32>
    %3 = vector.shape_cast %2 : vector<1x8x8x1x16xf32> to vector<8x8x1x16xf32>
    %4 = arith.maximumf %1, %3 : vector<8x8x1x16xf32>
    %5 = vector.shape_cast %4 : vector<8x8x1x16xf32> to vector<64x16xf32>
    %c0_8 = arith.constant 0 : index
    %c0_9 = arith.constant 0 : index
    %6 = vector.load %arg2[%c0_8, %c0_9] : memref<16x8xf32, #tpu.memory_space<vmem>>, vector<16x8xf32>
    %cst = arith.constant dense<0.000000e+00> : vector<64x8xf32>
    %7 = tpu.matmul %5, %6, %cst {dimension_numbers = #tpu.dot_dimension_numbers<[1], [0], [0], [1], [0, 0, 1, 1], [], []>} : vector<64x16xf32>, vector<16x8xf32>, vector<64x8xf32> -> vector<64x8xf32>
    %c0_10 = arith.constant 0 : index
    %c0_11 = arith.constant 0 : index
    %8 = vector.load %arg3[%c0_10, %c0_11] : memref<16x8xf32, #tpu.memory_space<vmem>>, vector<16x8xf32>
    %cst_12 = arith.constant dense<0.000000e+00> : vector<64x8xf32>
    %9 = tpu.matmul %5, %8, %cst_12 {dimension_numbers = #tpu.dot_dimension_numbers<[1], [0], [0], [1], [0, 0, 1, 1], [], []>} : vector<64x16xf32>, vector<16x8xf32>, vector<64x8xf32> -> vector<64x8xf32>
    %10 = arith.maximumf %7, %9 : vector<64x8xf32>
    %11 = vector.shape_cast %10 : vector<64x8xf32> to vector<8x8x8xf32>
    %c0_13 = arith.constant 0 : index
    %c0_14 = arith.constant 0 : index
    %c0_15 = arith.constant 0 : index
    %c0_16 = arith.constant 0 : index
    %12 = vector.load %arg4[%c0_13, %c0_14, %c0_15, %c0_16] : memref<1x8x8x8xf32, #tpu.memory_space<vmem>>, vector<1x8x8x8xf32>
    %13 = vector.shape_cast %12 : vector<1x8x8x8xf32> to vector<8x8x8xf32>
    %14 = vector.shape_cast %11 : vector<8x8x8xf32> to vector<1x8x8x8xf32>
    tpu.vector_store %arg4[%c0_13, %c0_14, %c0_15, %c0_16], %14 {strides = array<i32>} : memref<1x8x8x8xf32, #tpu.memory_space<vmem>>, vector<1x8x8x8xf32>,
    return
  }
  func.func @transform_0(%arg0: i32) -> (i32, i32, i32, i32, i32) {
    %c0_i32 = arith.constant 0 : i32
    %c0_i32_0 = arith.constant 0 : i32
    %c0_i32_1 = arith.constant 0 : i32
    %c0_i32_2 = arith.constant 0 : i32
    %c0_i32_3 = arith.constant 0 : i32
    return %arg0, %c0_i32, %c0_i32_0, %c0_i32_1, %c0_i32_2 : i32, i32, i32, i32, i32
  }
  func.func @transform_1(%arg0: i32) -> (i32, i32) {
    %c0_i32 = arith.constant 0 : i32
    %c0_i32_0 = arith.constant 0 : i32
    %c0_i32_1 = arith.constant 0 : i32
    return %c0_i32, %c0_i32_0 : i32, i32
  }
  func.func @transform_2(%arg0: i32) -> (i32, i32) {
    %c0_i32 = arith.constant 0 : i32
    %c0_i32_0 = arith.constant 0 : i32
    %c0_i32_1 = arith.constant 0 : i32
    return %c0_i32, %c0_i32_0 : i32, i32
  }
  func.func @transform_3(%arg0: i32) -> (i32, i32, i32, i32) {
    %c0_i32 = arith.constant 0 : i32
    %c0_i32_0 = arith.constant 0 : i32
    %c0_i32_1 = arith.constant 0 : i32
    %c0_i32_2 = arith.constant 0 : i32
    return %arg0, %c0_i32, %c0_i32_0, %c0_i32_1 : i32, i32, i32, i32
  }
}

</mosaic_0001>

<bundles_post_ra>
// kernel: down_conv_forward.3
= control target key start
LH: loop header
LB: loop body
LE: loop exit
PB: predicated region body
PF: predicated region fallthrough
CT: control target
= control target key end

     0   :  { %8 = vsyncpa [#allocation3], 0  ;;  %s1415_s0 = inlined_call_operand.vmem [shape: f32[2,8,8,2,16], index: 0, kind: input, shape index: {}]   ;;  %s1416_s1 = inlined_call_operand.vmem [shape: f32[16,8], index: 1, kind: input, shape index: {}]   ;;  %s1417_s2 = inlined_call_operand.vmem [shape: f32[16,8], index: 2, kind: input, shape index: {}]   ;;  %s1418_s3 = inlined_call_operand.hbm [shape: f32[2,8,8,8], index: 3, kind: output, shape index: {}]  }
   0x1   :  { %10 = vsyncpa [#allocation3 + $0x1], 0  ;;  %s1076_s12 = smov 0   ;;  %s1078_s13 = smov 0  }
   0x2   :  { %s1080_s14 = smov 0   ;;  %s1082_s15 = smov 0  }
   0x3 LB: > { %s1097_s16 = sadd.s32 4294967295, %s1051_s15   ;;  %s868_s17 = sadd.s32 4294967294, %s1051_s15   ;;  %s1051_s15 = sphi %s1082_s15, %s1424_s15   ;;  %s1047_s14 = sphi %s1080_s14, %s1423_s14   ;;  %s1043_s13 = sphi %s1078_s13, %s1422_s13   ;;  %s1039_s12 = sphi %s1076_s12, %s1421_s12  }
   0x4   : > { %s1101_s18 = sadd.s32 1, %s1051_s15   ;;  %s91_s19 = sadd.s32 1, %s1047_s14 }
   0x5   : > { %s88_s20 = ssub.s32 %s1051_s15, %s1101_s18  ;;  %p101_p0 = scmp.ne.s32.totalorder %s1047_s14, %s1043_s13 }
   0x6   : > { %p89_p1 = scmp.eq.s32.totalorder %s88_s20, 0  ;;  %p102_p2 = scmp.eq.s32.totalorder %s1097_s16, 1 }
   0x7   : > { %p107_p3 = scmp.ne.s32.totalorder %s1043_s13, %s1039_s12  ;;  %p108_p4 = scmp.eq.s32.totalorder %s868_s17, 1 }
   0x8   : > { %s1112_s21 = scalar_select %p89_p1, %s1047_s14, %s91_s19  }
   0x9   : > { %p1114_p5 = por %p102_p2, %p101_p0  ;;  %p1118_p6 = por %p108_p4, %p107_p3 }
   0xa   : > { %p871_p7 = scmp.ge.s32.totalorder %s1051_s15, 1  ;;  %p140_p8 = scmp.lt.s32.totalorder %s1051_s15, 3 }
   0xc   : > { %p141_p9 = pnand %p871_p7, %p140_p8 }
   0xd   : > { %p164_p10 = scmp.lt.s32.totalorder (!%p141_p9), %s1097_s16, 1  ;;  %s161_s10 = sand.u32 (!%p141_p9), 1, %s1043_s13  }
   0xe   : > { %144 = sbr.rel (%p141_p9) target bundleno = 298 (0x12a), region = 32  ;;  %s872_s11 = sshll.u32 (!%p141_p9), %s161_s10, 6 }
   0xf   : > { %s1346_s17 = scalar_lea.vmem (!%p141_p9), [#allocation2], %s872_s11  ;;  %s897_s19 = sshll.u32 (!%p141_p9), %s1097_s16, 10 }
  0x10   : > { %s806_s20 = sshll.u32 (!%p141_p9), %s1346_s17, 4  ;;  %s1365_s26 = scalar_lea.hbm (!%p141_p9), %s1418_s3, %s897_s19  ;;  %s1367_s20 = int_to_ptr.vmem [resolvable:$true] %s806_s20 }
  0x11   : > { %s991_s27 = scalar_lea.vmem (!%p141_p9), %s1367_s20, 1024  ;;  %s1053_s28 = smov (!%p141_p9), [#allocation2]  }
  0x12   : > { %p992_p11 = scmp.ne.s32.totalorder (!%p141_p9), %s1367_s20, %s991_s27  ;;  %s995_s29 = sshll.u32 (!%p141_p9), %s1053_s28, 4  ;;  %s996_s29 = int_to_ptr.vmem [resolvable:$false] %s995_s29 }
  0x13   : > { %v362_v0 = vld [vmem:[%s1416_s1 + $0x8] sm:$0xff]  ;;  %v361_v2 = vld [vmem:[%s1416_s1] sm:$0xff]  ;;  %s165_s5 = scalar_select %p164_p10, %s1097_s16, 1  ;;  %vm428_vm0 = vcmask 1041409   ;;  %vm431_vm1 = vcmask 1042434   ;;  %vm434_vm2 = vcmask 1043459  }
  0x14   : > { %v669_v1 = vld [vmem:[%s1417_s2 + $0x8] sm:$0xff]  ;;  %918 = vmatprep.subr.mxu0 %v362_v0  ;;  %v668_v3 = vld [vmem:[%s1417_s2] sm:$0xff]  ;;  %vm437_vm3 = vcmask 1044484   ;;  %vm440_vm4 = vcmask 1045509   ;;  %vm443_vm5 = vcmask 1046534   ;;  %vm446_vm6 = vcmask 1047559   ;;  %p993_p12 = pnand %p992_p11, %p1114_p5  ;;  %p998_p0 = scmp.lt.s32.totalorder %s1367_s20, %s996_s29 }
  0x15   : > { %934 = vmatprep.subr.mxu1 %v669_v1  ;;  %919 = vmatpush3.msra.mxu0 %v362_v0  ;;  %s896_s6 = sshll.u32 %s165_s5, 7  ;;  %vm546_vm7 = vcmask 130048   ;;  %vm783_vm8 = vcmask 64512   ;;  %s1375_s16 = scalar_lea.sflag [#allocation3], %s161_s10 }
  0x16   : > { %935 = vmatpush3.msra.mxu1 %v669_v1  ;;  %920 = vmatprep.subr.mxu0 %v361_v2  ;;  %s1141_s9 = scalar_lea.vmem %s1415_s0, %s896_s6  ;;  %p994_p13 = pneg %p993_p12 }
  0x17   : > { %936 = vmatprep.subr.mxu1 %v668_v3  ;;  %921 = vmatpush3.msra.mxu0 %v361_v2  ;;  %v169_v4 = vld [vmem:[%s1141_s9] sm:$0x1]  ;;  %v170_v5 = vld [vmem:[%s1141_s9 + $0x2] sm:$0x1]  ;;  %v171_v6 = vld [vmem:[%s1141_s9 + $0x4] sm:$0x1] }
  0x18   : > { %937 = vmatpush3.msra.mxu1 %v668_v3  ;;  %v172_v7 = vld [vmem:[%s1141_s9 + $0x6] sm:$0x1]  ;;  %v173_v8 = vld [vmem:[%s1141_s9 + $0x8] sm:$0x1]  ;;  %v174_v9 = vld [vmem:[%s1141_s9 + $0xa] sm:$0x1] }
  0x19   : > { %v175_v10 = vld [vmem:[%s1141_s9 + $0xc] sm:$0x1]  ;;  %v176_v11 = vld [vmem:[%s1141_s9 + $0xe] sm:$0x1]  ;;  %v233_v12 = vld [vmem:[%s1141_s9 + $0x1] sm:$0x1] }
  0x1a   : > { %v234_v13 = vld [vmem:[%s1141_s9 + $0x3] sm:$0x1]  ;;  %v235_v14 = vld [vmem:[%s1141_s9 + $0x5] sm:$0x1]  ;;  %v236_v15 = vld [vmem:[%s1141_s9 + $0x7] sm:$0x1]  ;;  %v297_v19 = vmax.f32 %v169_v4, %v233_v12 }
  0x1b   : > { %v237_v16 = vld [vmem:[%s1141_s9 + $0x9] sm:$0x1]  ;;  %v238_v17 = vld [vmem:[%s1141_s9 + $0xb] sm:$0x1]  ;;  %v239_v18 = vld [vmem:[%s1141_s9 + $0xd] sm:$0x1]  ;;  %v298_v20 = vmax.f32 %v170_v5, %v234_v13  ;;  %v299_v21 = vmax.f32 %v171_v6, %v235_v14  ;;  %v300_v22 = vmax.f32 %v172_v7, %v236_v15 }
  0x1c   : > { %v240_v23 = vld [vmem:[%s1141_s9 + $0xf] sm:$0x1]  ;;  %v301_v24 = vmax.f32 %v173_v8, %v237_v16  ;;  %v302_v25 = vmax.f32 %v174_v9, %v238_v17  ;;  %v303_v26 = vmax.f32 %v175_v10, %v239_v18  ;;  %v177_v27 = vld [vmem:[%s1141_s9 + $0x10] sm:$0x1]  ;;  %v178_v32 = vld [vmem:[%s1141_s9 + $0x12] sm:$0x1] }
  0x1d   : > { %v304_v28 = vmax.f32 %v176_v11, %v240_v23  ;;  %v427_v29 = vrot.slane %v298_v20, 7  ;;  %v430_v30 = vrot.slane %v299_v21, 6  ;;  %v433_v31 = vrot.slane %v300_v22, 5  ;;  %v179_v35 = vld [vmem:[%s1141_s9 + $0x14] sm:$0x1]  ;;  %s997_s30 = scalar_lea.vmem %s996_s29, 2048 }
  0x1e   : > { %v436_v33 = vrot.slane %v301_v24, 4  ;;  %v439_v34 = vrot.slane %v302_v25, 3  ;;  %v180_v36 = vld [vmem:[%s1141_s9 + $0x16] sm:$0x1]  ;;  %v442_v38 = vrot.slane %v303_v26, 2  ;;  %p999_p1 = scmp.lt.s32.totalorder %s997_s30, %s991_s27 }
  0x1f   : > { %v429_v37 = vsel %vm428_vm0, %v427_v29, %v297_v19  ;;  %v445_v39 = vrot.slane %v304_v28, 1  ;;  %v181_v40 = vld [vmem:[%s1141_s9 + $0x18] sm:$0x1]  ;;  %v182_v41 = vld [vmem:[%s1141_s9 + $0x1a] sm:$0x1] }
  0x20   : > { %v432_v42 = vsel %vm431_vm1, %v430_v30, %v429_v37  ;;  %v183_v43 = vld [vmem:[%s1141_s9 + $0x1c] sm:$0x1]  ;;  %v184_v44 = vld [vmem:[%s1141_s9 + $0x1e] sm:$0x1]  ;;  %v241_v45 = vld [vmem:[%s1141_s9 + $0x11] sm:$0x1]  ;;  %p1000_p2 = por %p999_p1, %p998_p0 }
  0x21   : > { %v435_v46 = vsel %vm434_vm2, %v433_v31, %v432_v42  ;;  %v242_v47 = vld [vmem:[%s1141_s9 + $0x13] sm:$0x1]  ;;  %v243_v48 = vld [vmem:[%s1141_s9 + $0x15] sm:$0x1]  ;;  %v244_v49 = vld [vmem:[%s1141_s9 + $0x17] sm:$0x1]  ;;  %v305_v50 = vmax.f32 %v177_v27, %v241_v45 }
  0x22   : > { %v438_v51 = vsel %vm437_vm3, %v436_v33, %v435_v46  ;;  %v245_v52 = vld [vmem:[%s1141_s9 + $0x19] sm:$0x1]  ;;  %v246_v53 = vld [vmem:[%s1141_s9 + $0x1b] sm:$0x1]  ;;  %v247_v54 = vld [vmem:[%s1141_s9 + $0x1d] sm:$0x1]  ;;  %v306_v55 = vmax.f32 %v178_v32, %v242_v47  ;;  %v307_v56 = vmax.f32 %v179_v35, %v243_v48  ;;  %v308_v57 = vmax.f32 %v180_v36, %v244_v49  ;;  %p1001_p3 = pnand %p1000_p2, %p994_p13 }
  0x23   : > { %v441_v58 = vsel %vm440_vm4, %v439_v34, %v438_v51  ;;  %v248_v59 = vld [vmem:[%s1141_s9 + $0x1f] sm:$0x1]  ;;  %v309_v60 = vmax.f32 %v181_v40, %v245_v52  ;;  %v310_v61 = vmax.f32 %v182_v41, %v246_v53  ;;  %v311_v62 = vmax.f32 %v183_v43, %v247_v54  ;;  %v185_v63 = vld [vmem:[%s1141_s9 + $0x20] sm:$0x1]  ;;  %v186_v0 = vld [vmem:[%s1141_s9 + $0x22] sm:$0x1] }
  0x24   : > { %v444_v1 = vsel %vm443_vm5, %v442_v38, %v441_v58  ;;  %v312_v2 = vmax.f32 %v184_v44, %v248_v59  ;;  %v448_v3 = vrot.slane %v306_v55, 7  ;;  %v450_v4 = vrot.slane %v307_v56, 6  ;;  %v187_v5 = vld [vmem:[%s1141_s9 + $0x24] sm:$0x1]  ;;  %v188_v6 = vld [vmem:[%s1141_s9 + $0x26] sm:$0x1] }
  0x25   : > { %v447_v7 = vsel %vm446_vm6, %v445_v39, %v444_v1  ;;  %v452_v8 = vrot.slane %v308_v57, 5  ;;  %v454_v9 = vrot.slane %v309_v60, 4  ;;  %v456_v10 = vrot.slane %v310_v61, 3  ;;  %v189_v11 = vld [vmem:[%s1141_s9 + $0x28] sm:$0x1] }
  0x26   : > { %922 = vmatprep.mubr.msk.f32.mxu0 %vm546_vm7, %v447_v7  ;;  %938 = vmatprep.mubr.msk.f32.mxu1 %vm546_vm7, %v447_v7  ;;  %v449_v12 = vsel %vm428_vm0, %v448_v3, %v305_v50  ;;  %v458_v13 = vrot.slane %v311_v62, 2  ;;  %v460_v14 = vrot.slane %v312_v2, 1  ;;  %v190_v15 = vld [vmem:[%s1141_s9 + $0x2a] sm:$0x1]  ;;  %v191_v16 = vld [vmem:[%s1141_s9 + $0x2c] sm:$0x1] }
  0x27   : > { %v451_v17 = vsel %vm431_vm1, %v450_v4, %v449_v12  ;;  %v192_v18 = vld [vmem:[%s1141_s9 + $0x2e] sm:$0x1]  ;;  %v249_v19 = vld [vmem:[%s1141_s9 + $0x21] sm:$0x1]  ;;  %v250_v20 = vld [vmem:[%s1141_s9 + $0x23] sm:$0x1] }
  0x28   : > { %v453_v21 = vsel %vm434_vm2, %v452_v8, %v451_v17  ;;  %v251_v22 = vld [vmem:[%s1141_s9 + $0x25] sm:$0x1]  ;;  %v252_v23 = vld [vmem:[%s1141_s9 + $0x27] sm:$0x1]  ;;  %v253_v24 = vld [vmem:[%s1141_s9 + $0x29] sm:$0x1]  ;;  %v313_v25 = vmax.f32 %v185_v63, %v249_v19  ;;  %v314_v26 = vmax.f32 %v186_v0, %v250_v20 }
  0x29   : > { %v455_v27 = vsel %vm437_vm3, %v454_v9, %v453_v21  ;;  %v254_v28 = vld [vmem:[%s1141_s9 + $0x2b] sm:$0x1]  ;;  %v255_v29 = vld [vmem:[%s1141_s9 + $0x2d] sm:$0x1]  ;;  %v256_v30 = vld [vmem:[%s1141_s9 + $0x2f] sm:$0x1]  ;;  %v315_v31 = vmax.f32 %v187_v5, %v251_v22  ;;  %v316_v32 = vmax.f32 %v188_v6, %v252_v23  ;;  %v317_v33 = vmax.f32 %v189_v11, %v253_v24 }
  0x2a   : > { %v457_v34 = vsel %vm440_vm4, %v456_v10, %v455_v27  ;;  %v318_v35 = vmax.f32 %v190_v15, %v254_v28  ;;  %v319_v36 = vmax.f32 %v191_v16, %v255_v29  ;;  %v320_v37 = vmax.f32 %v192_v18, %v256_v30  ;;  %v193_v38 = vld [vmem:[%s1141_s9 + $0x30] sm:$0x1]  ;;  %v194_v39 = vld [vmem:[%s1141_s9 + $0x32] sm:$0x1]  ;;  %v195_v44 = vld [vmem:[%s1141_s9 + $0x34] sm:$0x1] }
  0x2b   : > { %v459_v40 = vsel %vm443_vm5, %v458_v13, %v457_v34  ;;  %v462_v41 = vrot.slane %v314_v26, 7  ;;  %v464_v42 = vrot.slane %v315_v31, 6  ;;  %v466_v43 = vrot.slane %v316_v32, 5  ;;  %v196_v48 = vld [vmem:[%s1141_s9 + $0x36] sm:$0x1] }
  0x2c   : > { %v461_v45 = vsel %vm446_vm6, %v460_v14, %v459_v40  ;;  %v468_v46 = vrot.slane %v317_v33, 4  ;;  %v470_v47 = vrot.slane %v318_v35, 3  ;;  %v197_v49 = vld [vmem:[%s1141_s9 + $0x38] sm:$0x1]  ;;  %v472_v51 = vrot.slane %v319_v36, 2 }
  0x2d   : > { %923 = vmatmul.mubr.msk.f32.vlgmr.msra.gmra.mxu0 %vm546_vm7, %v461_v45  ;;  %939 = vmatmul.mubr.msk.f32.vlgmr.msra.gmra.mxu1 %vm546_vm7, %v461_v45  ;;  %v463_v50 = vsel %vm428_vm0, %v462_v41, %v313_v25  ;;  %v474_v52 = vrot.slane %v320_v37, 1  ;;  %v198_v53 = vld [vmem:[%s1141_s9 + $0x3a] sm:$0x1]  ;;  %v199_v54 = vld [vmem:[%s1141_s9 + $0x3c] sm:$0x1] }
  0x2e   : > { %v465_v55 = vsel %vm431_vm1, %v464_v42, %v463_v50  ;;  %v200_v56 = vld [vmem:[%s1141_s9 + $0x3e] sm:$0x1]  ;;  %v257_v57 = vld [vmem:[%s1141_s9 + $0x31] sm:$0x1]  ;;  %v258_v58 = vld [vmem:[%s1141_s9 + $0x33] sm:$0x1] }
  0x2f   : > { %v467_v59 = vsel %vm434_vm2, %v466_v43, %v465_v55  ;;  %v259_v60 = vld [vmem:[%s1141_s9 + $0x35] sm:$0x1]  ;;  %v260_v61 = vld [vmem:[%s1141_s9 + $0x37] sm:$0x1]  ;;  %v261_v62 = vld [vmem:[%s1141_s9 + $0x39] sm:$0x1]  ;;  %v321_v63 = vmax.f32 %v193_v38, %v257_v57  ;;  %v322_v0 = vmax.f32 %v194_v39, %v258_v58 }
  0x30   : > { %v469_v1 = vsel %vm437_vm3, %v468_v46, %v467_v59  ;;  %v262_v2 = vld [vmem:[%s1141_s9 + $0x3b] sm:$0x1]  ;;  %v263_v3 = vld [vmem:[%s1141_s9 + $0x3d] sm:$0x1]  ;;  %v264_v4 = vld [vmem:[%s1141_s9 + $0x3f] sm:$0x1]  ;;  %v323_v5 = vmax.f32 %v195_v44, %v259_v60  ;;  %v324_v6 = vmax.f32 %v196_v48, %v260_v61  ;;  %v325_v7 = vmax.f32 %v197_v49, %v261_v62 }
  0x31   : > { %v471_v8 = vsel %vm440_vm4, %v470_v47, %v469_v1  ;;  %v326_v9 = vmax.f32 %v198_v53, %v262_v2  ;;  %v327_v10 = vmax.f32 %v199_v54, %v263_v3  ;;  %v328_v11 = vmax.f32 %v200_v56, %v264_v4  ;;  %v201_v12 = vld [vmem:[%s1141_s9 + $0x40] sm:$0x1]  ;;  %v202_v13 = vld [vmem:[%s1141_s9 + $0x42] sm:$0x1]  ;;  %v203_v18 = vld [vmem:[%s1141_s9 + $0x44] sm:$0x1] }
  0x32   : > { %v473_v14 = vsel %vm443_vm5, %v472_v51, %v471_v8  ;;  %v476_v15 = vrot.slane %v322_v0, 7  ;;  %v478_v16 = vrot.slane %v323_v5, 6  ;;  %v480_v17 = vrot.slane %v324_v6, 5  ;;  %v204_v22 = vld [vmem:[%s1141_s9 + $0x46] sm:$0x1] }
  0x33   : > { %v475_v19 = vsel %vm446_vm6, %v474_v52, %v473_v14  ;;  %v482_v20 = vrot.slane %v325_v7, 4  ;;  %v484_v21 = vrot.slane %v326_v9, 3  ;;  %v205_v23 = vld [vmem:[%s1141_s9 + $0x48] sm:$0x1]  ;;  %v486_v25 = vrot.slane %v327_v10, 2 }
  0x34   : > { %925 = vmatprep.mubr.msk.f32.mxu0 %vm546_vm7, %v475_v19  ;;  %941 = vmatprep.mubr.msk.f32.mxu1 %vm546_vm7, %v475_v19  ;;  %v477_v24 = vsel %vm428_vm0, %v476_v15, %v321_v63  ;;  %v488_v26 = vrot.slane %v328_v11, 1  ;;  %v206_v27 = vld [vmem:[%s1141_s9 + $0x4a] sm:$0x1]  ;;  %v207_v28 = vld [vmem:[%s1141_s9 + $0x4c] sm:$0x1] }
  0x35   : > { %v479_v29 = vsel %vm431_vm1, %v478_v16, %v477_v24  ;;  %v208_v30 = vld [vmem:[%s1141_s9 + $0x4e] sm:$0x1]  ;;  %v265_v31 = vld [vmem:[%s1141_s9 + $0x41] sm:$0x1]  ;;  %v266_v32 = vld [vmem:[%s1141_s9 + $0x43] sm:$0x1] }
  0x36   : > { %v481_v33 = vsel %vm434_vm2, %v480_v17, %v479_v29  ;;  %v267_v34 = vld [vmem:[%s1141_s9 + $0x45] sm:$0x1]  ;;  %v268_v35 = vld [vmem:[%s1141_s9 + $0x47] sm:$0x1]  ;;  %v269_v36 = vld [vmem:[%s1141_s9 + $0x49] sm:$0x1]  ;;  %v329_v37 = vmax.f32 %v201_v12, %v265_v31  ;;  %v330_v38 = vmax.f32 %v202_v13, %v266_v32 }
  0x37   : > { %v483_v39 = vsel %vm437_vm3, %v482_v20, %v481_v33  ;;  %v270_v40 = vld [vmem:[%s1141_s9 + $0x4b] sm:$0x1]  ;;  %v271_v41 = vld [vmem:[%s1141_s9 + $0x4d] sm:$0x1]  ;;  %v272_v42 = vld [vmem:[%s1141_s9 + $0x4f] sm:$0x1]  ;;  %v331_v43 = vmax.f32 %v203_v18, %v267_v34  ;;  %v332_v44 = vmax.f32 %v204_v22, %v268_v35  ;;  %v333_v45 = vmax.f32 %v205_v23, %v269_v36 }
  0x38   : > { %v485_v46 = vsel %vm440_vm4, %v484_v21, %v483_v39  ;;  %v334_v47 = vmax.f32 %v206_v27, %v270_v40  ;;  %v335_v48 = vmax.f32 %v207_v28, %v271_v41  ;;  %v336_v49 = vmax.f32 %v208_v30, %v272_v42  ;;  %v209_v50 = vld [vmem:[%s1141_s9 + $0x50] sm:$0x1]  ;;  %v210_v51 = vld [vmem:[%s1141_s9 + $0x52] sm:$0x1]  ;;  %v211_v56 = vld [vmem:[%s1141_s9 + $0x54] sm:$0x1] }
  0x39   : > { %v487_v52 = vsel %vm443_vm5, %v486_v25, %v485_v46  ;;  %v490_v53 = vrot.slane %v330_v38, 7  ;;  %v492_v54 = vrot.slane %v331_v43, 6  ;;  %v494_v55 = vrot.slane %v332_v44, 5  ;;  %v212_v60 = vld [vmem:[%s1141_s9 + $0x56] sm:$0x1] }
  0x3a   : > { %v489_v57 = vsel %vm446_vm6, %v488_v26, %v487_v52  ;;  %v496_v58 = vrot.slane %v333_v45, 4  ;;  %v498_v59 = vrot.slane %v334_v47, 3  ;;  %v213_v61 = vld [vmem:[%s1141_s9 + $0x58] sm:$0x1]  ;;  %v500_v63 = vrot.slane %v335_v48, 2 }
  0x3b   : > { %926 = vmatmul.mubr.msk.f32.gmra.mxu0 %vm546_vm7, %v489_v57  ;;  %942 = vmatmul.mubr.msk.f32.gmra.mxu1 %vm546_vm7, %v489_v57  ;;  %v491_v62 = vsel %vm428_vm0, %v490_v53, %v329_v37  ;;  %v502_v0 = vrot.slane %v336_v49, 1  ;;  %v214_v1 = vld [vmem:[%s1141_s9 + $0x5a] sm:$0x1]  ;;  %v215_v2 = vld [vmem:[%s1141_s9 + $0x5c] sm:$0x1] }
  0x3c   : > { %v493_v3 = vsel %vm431_vm1, %v492_v54, %v491_v62  ;;  %v216_v4 = vld [vmem:[%s1141_s9 + $0x5e] sm:$0x1]  ;;  %v273_v5 = vld [vmem:[%s1141_s9 + $0x51] sm:$0x1]  ;;  %v274_v6 = vld [vmem:[%s1141_s9 + $0x53] sm:$0x1] }
  0x3d   : > { %v495_v7 = vsel %vm434_vm2, %v494_v55, %v493_v3  ;;  %v275_v8 = vld [vmem:[%s1141_s9 + $0x55] sm:$0x1]  ;;  %v276_v9 = vld [vmem:[%s1141_s9 + $0x57] sm:$0x1]  ;;  %v277_v10 = vld [vmem:[%s1141_s9 + $0x59] sm:$0x1]  ;;  %v337_v11 = vmax.f32 %v209_v50, %v273_v5  ;;  %v338_v12 = vmax.f32 %v210_v51, %v274_v6 }
  0x3e   : > { %v497_v13 = vsel %vm437_vm3, %v496_v58, %v495_v7  ;;  %v278_v14 = vld [vmem:[%s1141_s9 + $0x5b] sm:$0x1]  ;;  %v279_v15 = vld [vmem:[%s1141_s9 + $0x5d] sm:$0x1]  ;;  %v280_v16 = vld [vmem:[%s1141_s9 + $0x5f] sm:$0x1]  ;;  %v339_v17 = vmax.f32 %v211_v56, %v275_v8  ;;  %v340_v18 = vmax.f32 %v212_v60, %v276_v9  ;;  %v341_v19 = vmax.f32 %v213_v61, %v277_v10 }
  0x3f   : > { %v499_v20 = vsel %vm440_vm4, %v498_v59, %v497_v13  ;;  %v342_v21 = vmax.f32 %v214_v1, %v278_v14  ;;  %v343_v22 = vmax.f32 %v215_v2, %v279_v15  ;;  %v344_v23 = vmax.f32 %v216_v4, %v280_v16  ;;  %v217_v24 = vld [vmem:[%s1141_s9 + $0x60] sm:$0x1]  ;;  %v218_v25 = vld [vmem:[%s1141_s9 + $0x62] sm:$0x1]  ;;  %v219_v30 = vld [vmem:[%s1141_s9 + $0x64] sm:$0x1] }
  0x40   : > { %v501_v26 = vsel %vm443_vm5, %v500_v63, %v499_v20  ;;  %v504_v27 = vrot.slane %v338_v12, 7  ;;  %v506_v28 = vrot.slane %v339_v17, 6  ;;  %v508_v29 = vrot.slane %v340_v18, 5  ;;  %v220_v34 = vld [vmem:[%s1141_s9 + $0x66] sm:$0x1] }
  0x41   : > { %v503_v31 = vsel %vm446_vm6, %v502_v0, %v501_v26  ;;  %v510_v32 = vrot.slane %v341_v19, 4  ;;  %v512_v33 = vrot.slane %v342_v21, 3  ;;  %v221_v35 = vld [vmem:[%s1141_s9 + $0x68] sm:$0x1]  ;;  %v514_v37 = vrot.slane %v343_v22, 2 }
  0x42   : > { %928 = vmatprep.mubr.msk.f32.mxu0 %vm546_vm7, %v503_v31  ;;  %944 = vmatprep.mubr.msk.f32.mxu1 %vm546_vm7, %v503_v31  ;;  %v505_v36 = vsel %vm428_vm0, %v504_v27, %v337_v11  ;;  %v516_v38 = vrot.slane %v344_v23, 1  ;;  %v222_v39 = vld [vmem:[%s1141_s9 + $0x6a] sm:$0x1]  ;;  %v223_v40 = vld [vmem:[%s1141_s9 + $0x6c] sm:$0x1] }
  0x43   : > { %v507_v41 = vsel %vm431_vm1, %v506_v28, %v505_v36  ;;  %v224_v42 = vld [vmem:[%s1141_s9 + $0x6e] sm:$0x1]  ;;  %v281_v43 = vld [vmem:[%s1141_s9 + $0x61] sm:$0x1]  ;;  %v282_v44 = vld [vmem:[%s1141_s9 + $0x63] sm:$0x1] }
  0x44   : > { %v509_v45 = vsel %vm434_vm2, %v508_v29, %v507_v41  ;;  %v283_v46 = vld [vmem:[%s1141_s9 + $0x65] sm:$0x1]  ;;  %v284_v47 = vld [vmem:[%s1141_s9 + $0x67] sm:$0x1]  ;;  %v285_v48 = vld [vmem:[%s1141_s9 + $0x69] sm:$0x1]  ;;  %v345_v49 = vmax.f32 %v217_v24, %v281_v43  ;;  %v346_v50 = vmax.f32 %v218_v25, %v282_v44 }
  0x45   : > { %v511_v51 = vsel %vm437_vm3, %v510_v32, %v509_v45  ;;  %v286_v52 = vld [vmem:[%s1141_s9 + $0x6b] sm:$0x1]  ;;  %v287_v53 = vld [vmem:[%s1141_s9 + $0x6d] sm:$0x1]  ;;  %v288_v54 = vld [vmem:[%s1141_s9 + $0x6f] sm:$0x1]  ;;  %v347_v55 = vmax.f32 %v219_v30, %v283_v46  ;;  %v348_v56 = vmax.f32 %v220_v34, %v284_v47  ;;  %v349_v57 = vmax.f32 %v221_v35, %v285_v48 }
  0x46   : > { %v513_v58 = vsel %vm440_vm4, %v512_v33, %v511_v51  ;;  %v350_v59 = vmax.f32 %v222_v39, %v286_v52  ;;  %v351_v60 = vmax.f32 %v223_v40, %v287_v53  ;;  %v352_v61 = vmax.f32 %v224_v42, %v288_v54  ;;  %v225_v62 = vld [vmem:[%s1141_s9 + $0x70] sm:$0x1]  ;;  %v226_v63 = vld [vmem:[%s1141_s9 + $0x72] sm:$0x1]  ;;  %v227_v4 = vld [vmem:[%s1141_s9 + $0x74] sm:$0x1] }
  0x47   : > { %v515_v0 = vsel %vm443_vm5, %v514_v37, %v513_v58  ;;  %v518_v1 = vrot.slane %v346_v50, 7  ;;  %v520_v2 = vrot.slane %v347_v55, 6  ;;  %v522_v3 = vrot.slane %v348_v56, 5  ;;  %v228_v8 = vld [vmem:[%s1141_s9 + $0x76] sm:$0x1] }
  0x48   : > { %v517_v5 = vsel %vm446_vm6, %v516_v38, %v515_v0  ;;  %v524_v6 = vrot.slane %v349_v57, 4  ;;  %v526_v7 = vrot.slane %v350_v59, 3  ;;  %v229_v9 = vld [vmem:[%s1141_s9 + $0x78] sm:$0x1]  ;;  %v528_v11 = vrot.slane %v351_v60, 2 }
  0x49   : > { %929 = vmatmul.mubr.msk.f32.gmra.mxu0 %vm546_vm7, %v517_v5  ;;  %945 = vmatmul.mubr.msk.f32.gmra.mxu1 %vm546_vm7, %v517_v5  ;;  %v519_v10 = vsel %vm428_vm0, %v518_v1, %v345_v49  ;;  %v530_v12 = vrot.slane %v352_v61, 1  ;;  %v230_v13 = vld [vmem:[%s1141_s9 + $0x7a] sm:$0x1]  ;;  %v231_v14 = vld [vmem:[%s1141_s9 + $0x7c] sm:$0x1] }
  0x4a   : > { %v521_v15 = vsel %vm431_vm1, %v520_v2, %v519_v10  ;;  %v232_v16 = vld [vmem:[%s1141_s9 + $0x7e] sm:$0x1]  ;;  %v289_v17 = vld [vmem:[%s1141_s9 + $0x71] sm:$0x1]  ;;  %v290_v18 = vld [vmem:[%s1141_s9 + $0x73] sm:$0x1] }
  0x4b   : > { %v523_v19 = vsel %vm434_vm2, %v522_v3, %v521_v15  ;;  %v291_v20 = vld [vmem:[%s1141_s9 + $0x75] sm:$0x1]  ;;  %v292_v21 = vld [vmem:[%s1141_s9 + $0x77] sm:$0x1]  ;;  %v293_v22 = vld [vmem:[%s1141_s9 + $0x79] sm:$0x1]  ;;  %v353_v23 = vmax.f32 %v225_v62, %v289_v17  ;;  %v354_v24 = vmax.f32 %v226_v63, %v290_v18 }
  0x4c   : > { %v525_v25 = vsel %vm437_vm3, %v524_v6, %v523_v19  ;;  %v294_v26 = vld [vmem:[%s1141_s9 + $0x7b] sm:$0x1]  ;;  %v295_v27 = vld [vmem:[%s1141_s9 + $0x7d] sm:$0x1]  ;;  %v296_v28 = vld [vmem:[%s1141_s9 + $0x7f] sm:$0x1]  ;;  %v355_v29 = vmax.f32 %v227_v4, %v291_v20  ;;  %v356_v30 = vmax.f32 %v228_v8, %v292_v21  ;;  %v357_v31 = vmax.f32 %v229_v9, %v293_v22 }
  0x4d   : > { %v527_v32 = vsel %vm440_vm4, %v526_v7, %v525_v25  ;;  %v358_v33 = vmax.f32 %v230_v13, %v294_v26  ;;  %v359_v34 = vmax.f32 %v231_v14, %v295_v27  ;;  %v360_v35 = vmax.f32 %v232_v16, %v296_v28 }
  0x4e   : > { %v529_v36 = vsel %vm443_vm5, %v528_v11, %v527_v32  ;;  %v532_v37 = vrot.slane %v354_v24, 7  ;;  %v534_v38 = vrot.slane %v355_v29, 6  ;;  %v536_v39 = vrot.slane %v356_v30, 5 }
  0x4f   : > { %v531_v40 = vsel %vm446_vm6, %v530_v12, %v529_v36  ;;  %v538_v41 = vrot.slane %v357_v31, 4  ;;  %v540_v43 = vrot.slane %v358_v33, 3  ;;  %v542_v45 = vrot.slane %v359_v34, 2 }
  0x50   : > { %931 = vmatprep.mubr.msk.f32.mxu0 %vm546_vm7, %v531_v40  ;;  %947 = vmatprep.mubr.msk.f32.mxu1 %vm546_vm7, %v531_v40  ;;  %v533_v42 = vsel %vm428_vm0, %v532_v37, %v353_v23  ;;  %v544_v47 = vrot.slane %v360_v35, 1 }
  0x51   : > { %v535_v44 = vsel %vm431_vm1, %v534_v38, %v533_v42 }
  0x52   : > { %v537_v46 = vsel %vm434_vm2, %v536_v39, %v535_v44 }
  0x53   : > { %v539_v48 = vsel %vm437_vm3, %v538_v41, %v537_v46 }
  0x54   : > { %v541_v49 = vsel %vm440_vm4, %v540_v43, %v539_v48 }
  0x55   : > { %v543_v50 = vsel %vm443_vm5, %v542_v45, %v541_v49 }
  0x56   : > { %v545_v51 = vsel %vm446_vm6, %v544_v47, %v543_v50 }
  0x57   : > { %932 = vmatmul.mubr.msk.f32.gmra.mxu0 %vm546_vm7, %v545_v51  ;;  %948 = vmatmul.mubr.msk.f32.gmra.mxu1 %vm546_vm7, %v545_v51 }
  0xed   : > { %v924_v52 = vpop.f32.mrf.mxu0  ;;  %v940_v53 = vpop.f32.mrf.mxu1 }
  0xee   : > { %v776_v54 = vmax.f32 %v924_v52, %v940_v53 }
  0xef   : > { %v629_v55 = vpop.f32.mrf.mxu0  ;;  %v736_v56 = vpop.f32.mrf.mxu1 }
  0xf0   : > { %785 = vst.msk [vmem:[%s1346_s17 + $0x8] sm:$0xff] %vm783_vm8, %v776_v54  ;;  %v775_v57 = vmax.f32 %v629_v55, %v736_v56 }
  0xf2   : > { %784 = vst.msk [vmem:[%s1346_s17] sm:$0xff] %vm783_vm8, %v775_v57 }
  0xfb   : > { %v927_v58 = vpop.f32.mrf.mxu0  ;;  %v943_v59 = vpop.f32.mrf.mxu1 }
  0xfc   : > { %v778_v60 = vmax.f32 %v927_v58, %v943_v59 }
  0xfd   : > { %v639_v61 = vpop.f32.mrf.mxu0  ;;  %v746_v62 = vpop.f32.mrf.mxu1 }
  0xfe   : > { %787 = vst.msk [vmem:[%s1346_s17 + $0x18] sm:$0xff] %vm783_vm8, %v778_v60  ;;  %v777_v63 = vmax.f32 %v639_v61, %v746_v62 }
 0x100   : > { %786 = vst.msk [vmem:[%s1346_s17 + $0x10] sm:$0xff] %vm783_vm8, %v777_v63 }
 0x109   : > { %v930_v0 = vpop.f32.mrf.mxu0  ;;  %v946_v1 = vpop.f32.mrf.mxu1 }
 0x10a   : > { %v780_v2 = vmax.f32 %v930_v0, %v946_v1 }
 0x10b   : > { %v649_v3 = vpop.f32.mrf.mxu0  ;;  %v756_v4 = vpop.f32.mrf.mxu1 }
 0x10c   : > { %789 = vst.msk [vmem:[%s1346_s17 + $0x28] sm:$0xff] %vm783_vm8, %v780_v2  ;;  %v779_v5 = vmax.f32 %v649_v3, %v756_v4 }
 0x10e   : > { %788 = vst.msk [vmem:[%s1346_s17 + $0x20] sm:$0xff] %vm783_vm8, %v779_v5 }
 0x117   : > { %v933_v6 = vpop.f32.mrf.mxu0  ;;  %v949_v7 = vpop.f32.mrf.mxu1 }
 0x118   : > { %v782_v8 = vmax.f32 %v933_v6, %v949_v7 }
 0x119   : > { %v659_v9 = vpop.f32.mrf.mxu0  ;;  %v766_v10 = vpop.f32.mrf.mxu1 }
 0x11a   : > { %791 = vst.msk [vmem:[%s1346_s17 + $0x38] sm:$0xff] %vm783_vm8, %v782_v8  ;;  %v781_v11 = vmax.f32 %v659_v9, %v766_v10 }
 0x11c   : > { %790 = vst.msk [vmem:[%s1346_s17 + $0x30] sm:$0xff] %vm783_vm8, %v781_v11 }
 0x11d   : > { %1004 = shalt.err (!%p1001_p3)
}
 0x11e   : > { %s1005_s4 = scalar_lea.hbm %s1365_s26, 1024  ;;  %s1009_s7 = scalar_lea.hbm %s1418_s3, 2048 }
 0x11f   : > { %p1006_p4 = scmp.ne.s32.totalorder %s1365_s26, %s1005_s4  ;;  %p1010_p9 = scmp.lt.s32.totalorder %s1365_s26, %s1418_s3 }
 0x120   : > { %p1011_p10 = scmp.lt.s32.totalorder %s1009_s7, %s1005_s4 }
 0x121   : > { %p1007_p7 = pnand %p1006_p4, %p1114_p5 }
 0x122   : > { %p1012_p11 = por %p1011_p10, %p1010_p9 }
 0x123   : > { %p1008_p8 = pneg %p1007_p7 }
 0x125   : > { %p1013_p12 = pnand %p1012_p11, %p1008_p8 }
 0x127   : > { %1016 = shalt.err (!%p1013_p12)
}
 0x128   : > { %s1054_s10 = smov 128   ;;  %s1055_s11 = smov 8  }
 0x129   : > { %950 = dma.vmem_to_hbm [thread:$0]  (%p1114_p5), %s1367_s20, 1024, %s1365_s26, %s1375_s16, %s1054_s10, %s1054_s10, %s1055_s11  }
 0x12a PF: > { %p956_p13 = scmp.ge.s32.totalorder %s1051_s15, 2  ;;  %s821_s17 = sand.u32 1, %s1039_s12  }
 0x12b   : > { %s822_s19 = scalar_lea.sflag [#allocation3], %s821_s17 }
 0x12c   : > { %p953_p0 = pnand %p956_p13, %p1118_p6 }
 0x12e   : > { %p954_p1 = pneg %p953_p0 }
 0x130   : > { %1034 = dma.done.wait (%p954_p1), %s822_s19, 1024  }
 0x131   : > { %1036 = vsyncadd (%p954_p1), %s822_s19, 4294966272  ;;  %p13_p2 = scmp.ge.s32.totalorder %s1101_s18, 4   ;;  %s1421_s12 = smov %s1043_s13 }
 0x132   : > { %s1422_s13 = smov %s1047_s14  ;;  %s1423_s14 = smov %s1112_s21 }
 0x133   : > { %s1424_s15 = smov %s1101_s18  ;;  %15 = sbr.rel (!%p13_p2) target bundleno = 3 (0x3), region = 67 }
 0x138   :  { %827 = vsyncpa [#allocation3], 1 }
 0x139   :  { %829 = vsyncpa [#allocation3 + $0x1], 1 }

// kernel: down_conv_forward.2
= control target key start
LH: loop header
LB: loop body
LE: loop exit
PB: predicated region body
PF: predicated region fallthrough
CT: control target
= control target key end

     0   :  { %s1185_s24 = smov 0   ;;  %s1424_s0 = inlined_call_operand.vmem [shape: bf16[2,4,290], index: 0, kind: input, shape index: {}]   ;;  %s1425_s1 = inlined_call_operand.vmem [shape: bf16[8,36], index: 1, kind: input, shape index: {}]   ;;  %s1426_s2 = inlined_call_operand.vmem [shape: f32[8,1], index: 2, kind: input, shape index: {}]   ;;  %s1427_s3 = inlined_call_operand.vmem [shape: bf16[8,72], index: 3, kind: input, shape index: {}]   ;;  %s1428_s4 = inlined_call_operand.vmem [shape: f32[8,1], index: 4, kind: input, shape index: {}]   ;;  %s1429_s5 = inlined_call_operand.vmem [shape: bf16[1,256], index: 5, kind: input, shape index: {}]   ;;  %s1430_s6 = inlined_call_operand.vmem [shape: bf16[1,256], index: 6, kind: input, shape index: {}]   ;;  %s1431_s7 = inlined_call_operand.vmem [shape: f32[2,8,256], index: 7, kind: output, shape index: {}]  }
   0x1 LB: > { %s1046_s25 = sadd.s32 4294967295, %s1126_s24   ;;  %p1050_p0 = scmp.ge.s32.totalorder %s1126_s24, 1  ;;  %s1126_s24 = sphi %s1185_s24, %s17_s24  }
   0x2   : > { %p237_p1 = scmp.lt.s32.totalorder %s1126_s24, 3 }
   0x4   : > { %p238_p2 = pnand %p1050_p0, %p237_p1 }
   0x5   : > { %p269_p3 = scmp.lt.s32.totalorder (!%p238_p2), %s1046_s25, 1  ;;  %s1130_s11 = smov (!%p238_p2), 34  }
   0x6   : > { %241 = sbr.rel (%p238_p2) target bundleno = 992 (0x3e0), region = 48  ;;  %s1131_s12 = smov (!%p238_p2), 18  }
   0x7   : > { %s1132_s13 = smov (!%p238_p2), 32   ;;  %s1133_s14 = smov (!%p238_p2), 2  }
   0x8   : > { %s1134_s15 = smov (!%p238_p2), 16   ;;  %s1135_s16 = smov (!%p238_p2), 111  }
   0x9   : > { %s1136_s17 = smov (!%p238_p2), 95   ;;  %s1137_s18 = smov (!%p238_p2), 127  }
   0xa   : > { %s1138_s19 = smov (!%p238_p2), 94   ;;  %s1139_s20 = smov (!%p238_p2), 96  }
   0xb   : > { %v1055_v0 = vld.sshfl [vmem:[%s1430_s6] sm:$0x11 pattern:$0x75316420]  ;;  %v295_v1 = vlaneseq  ;;  %v1128_v2 = vmov 1966171168  }
   0xc   : > { %v293_v3 = vunpack.c.l.s4 %v1128_v2  ;;  %v1129_v5 = vmov 1983009808   ;;  %v1054_v7 = vld.sshfl [vmem:[%s1429_s5] sm:$0x11 pattern:$0x75316420]  ;;  %v341_v9 = vcombine.high %v1055_v0, %v1055_v0 }
   0xd   : > { %v296_v4 = vshrl.u32 %v295_v1, 7  ;;  %v324_v6 = vunpack.c.l.s4 %v1129_v5  ;;  %v291_v10 = vcombine.high %v1054_v7, %v1054_v7  ;;  %s1442_s25 = smov (!%p269_p3, %s1046_s25), 1  ;;  %vm411_vm0 = vcmask 277504   ;;  %s1140_s21 = smov 110  }
   0xe   : > { %v294_v8 = vunpack.c.0.s8 %v293_v3  ;;  %s1087_s30 = smul.u32 6, %s1442_s25  ;;  %vm397_vm1 = vcmask 146432   ;;  %vm404_vm2 = vcmask 261120   ;;  %vm383_vm3 = vcmask 15360   ;;  %s1141_s22 = smov 126  }
   0xf   : > { %v311_v12 = vsub.s32 0, %v296_v4  ;;  %v325_v13 = vunpack.c.0.s8 %v324_v6  ;;  %vm390_vm4 = vcmask 130048   ;;  %s1143_s23 = smov 112   ;;  %vm609_vm5 = vcmask 769024  }
  0x10   : > { %v297_v11 = vsub.s32 %v294_v8, %v296_v4  ;;  %s273_s10 = scalar_lea.vmem %s1424_s0, %s1087_s30  ;;  %vm612_vm6 = vcmask 1041408   ;;  %vm519_vm7 = vcmask 908288   ;;  %vm545_vm8 = vcmask 900096   ;;  %s1144_s30 = smov 17  }
  0x11   : > { %v1202_v22 = vsub.s32 %v325_v13, %v296_v4  ;;  %v1211_v29 = vld [vmem:[%s273_s10] sm:$0xf]  ;;  %vm572_vm9 = vcmask 785408   ;;  %vm619_vm10 = vcmask 1043456   ;;  %vm583_vm11 = vcmask 777216  }
  0x12   : > { %v348_v14 = vrot.slane %v1055_v0, %v297_v11  ;;  %v355_v15 = vrot.slane %v341_v9, %v297_v11  ;;  %v298_v16 = vrot.slane %v1054_v7, %v297_v11  ;;  %v305_v17 = vrot.slane %v291_v10, %v297_v11  ;;  %v1213_v30 = vld [vmem:[%s273_s10] sm:$0x3f] }
  0x13   : > { %v504_v34 = vcombine.high %v1213_v30, %v1213_v30  ;;  %v439_v36 = vrot.slane %v1213_v30, %v1202_v22  ;;  %v425_v37 = vcombine.low %v1213_v30, %v1213_v30  ;;  %vm624_vm12 = vcmask 1045504  }
  0x14   : > { %v357_v18 = vpack.i.b16 %v348_v14, %v348_v14  ;;  %v364_v19 = vpack.i.b16 %v355_v15, %v355_v15  ;;  %v307_v20 = vpack.i.b16 %v298_v16, %v298_v16  ;;  %v314_v21 = vpack.i.b16 %v305_v17, %v305_v17 }
  0x15   : > { %v511_v35 = vrot.slane %v504_v34, %v1202_v22  ;;  %v512_v38 = vcombine.high %v439_v36, %v439_v36  ;;  %v432_v39 = vrot.slane %v425_v37, %v1202_v22  ;;  %v576_v41 = vcombine.low %v439_v36, %v439_v36 }
  0x16   : > { %v362_v23 = vrot.slane %v357_v18, %v311_v12  ;;  %v369_v24 = vrot.slane %v364_v19, %v311_v12  ;;  %v312_v25 = vrot.slane %v307_v20, %v311_v12  ;;  %v319_v26 = vrot.slane %v314_v21, %v311_v12 }
  0x17   : > { %v575_v40 = vcombine.low %v432_v39, %v432_v39  ;;  %v440_v42 = vcombine.high %v432_v39, %v432_v39  ;;  %v1142_v17 = vmov 0   ;;  %vm1432_vm13 = vcmask 1039360  }
  0x18   : > { %v1207_v27 = vcombine.low %v362_v23, %v369_v24  ;;  %v1209_v28 = vcombine.low %v312_v25, %v319_v26  ;;  %696 = vmatprep.mubr.bf16.mxu0 %v1142_v17  ;;  %707 = vst [vmem:[#allocation2] sm:$0xff] %v1142_v17  ;;  %1113 = vset.pattern.permute.xlu1 %v1142_v17  ;;  %v648_v24 = vld [vmem:[%s1426_s2] sm:$0xff]  ;;  %vm1434_vm14 = vcmask 1031168   ;;  %vm1433_vm15 = vcmask 916480  }
  0x19   : > { %978 = vmatprep.mubr.bf16.mxu1 %v1142_v17  ;;  %1114 = vset.pattern.permute.xlu0 %v1142_v17 }
  0x1a   : > { %v379_v31 = vrot.slane %v1207_v27, %v1202_v22  ;;  %v1219_v32 = vrot.slane %v1209_v28, %v1202_v22 }
  0x1c   : > { %408 = vrot.lane.b32.xlu1 %v379_v31, %s1130_s11  ;;  %394 = vrot.lane.b32.xlu0 %v379_v31, %s1131_s12  ;;  %v331_v33 = vmul.bf16 %v1219_v32, %v1211_v29 }
  0x20   : > { %401 = vrot.lane.b32.xlu0 %v1219_v32, %s1132_s13  ;;  %380 = vrot.lane.b32.xlu1 %v379_v31, %s1133_s14 }
  0x24   : > { %387 = vrot.lane.b32.xlu0 %v1219_v32, %s1134_s15  ;;  %517 = vrot.lane.b32.xlu1 %v511_v35, %s1135_s16 }
  0x28   : > { %515 = vrot.lane.b32.xlu0 %v512_v38, %s1135_s16  ;;  %579 = vrot.lane.b32.xlu1 %v432_v39, %s1136_s17 }
  0x2c   : > { %513 = vrot.lane.b32.xlu0 %v439_v36, %s1135_s16  ;;  %577 = vrot.lane.b32.xlu1 %v575_v40, %s1136_s17 }
  0x30   : > { %581 = vrot.lane.b32.xlu0 %v576_v41, %s1136_s17  ;;  %445 = vrot.lane.b32.xlu1 %v439_v36, %s1137_s18 }
  0x34   : > { %443 = vrot.lane.b32.xlu0 %v440_v42, %s1137_s18 }
  0x38   : > { %441 = vrot.lane.b32.xlu0 %v432_v39, %s1137_s18 }
  0x8e   : > { %v409_v43 = vpop.permute.xlu1 %408  ;;  %v395_v44 = vpop.permute.xlu0 %394 }
  0x8f   : > { %v410_v45 = vrot.slane %v409_v43, 6  ;;  %v396_v46 = vrot.slane %v395_v44, 6 }
  0x91   : > { %v412_v47 = vsel %vm411_vm0, %v410_v45, %v409_v43  ;;  %v398_v48 = vsel %vm397_vm1, %v396_v46, %v395_v44 }
  0x92   : > { %v414_v49 = vmul.bf16 %v412_v47, %v1213_v30  ;;  %v402_v50 = vpop.permute.xlu0 %401  ;;  %v381_v51 = vpop.permute.xlu1 %380  ;;  %v400_v54 = vmul.bf16 %v398_v48, %v1213_v30 }
  0x93   : > { %v403_v52 = vrot.slane %v402_v50, 6  ;;  %v382_v53 = vrot.slane %v381_v51, 6 }
  0x94   : > { %v594_v55 = vrot.slane %v414_v49, %v1202_v22  ;;  %v537_v63 = vrot.slane %v400_v54, %v1202_v22  ;;  %v587_v1 = vcombine.high %v414_v49, %v414_v49  ;;  %v523_v2 = vcombine.low %v400_v54, %v400_v54 }
  0x95   : > { %v405_v56 = vsel %vm404_vm2, %v403_v52, %v402_v50  ;;  %v384_v57 = vsel %vm383_vm3, %v382_v53, %v381_v51 }
  0x96   : > { %v407_v58 = vmul.bf16 %v405_v56, %v1213_v30  ;;  %603 = vrot.lane.b32.xlu1 %v594_v55, %s1138_s19  ;;  %v388_v59 = vpop.permute.xlu0 %387  ;;  %v386_v61 = vmul.bf16 %v384_v57, %v1213_v30  ;;  %v602_v3 = vcombine.high %v594_v55, %v594_v55  ;;  %v601_v8 = vrot.slane %v587_v1, %v1202_v22  ;;  %v518_v26 = vpop.permute.xlu1 %517 }
  0x97   : > { %v389_v60 = vrot.slane %v388_v59, 6  ;;  %v530_v9 = vrot.slane %v523_v2, %v1202_v22  ;;  %v422_v56 = vrot.slane %v331_v33, %v1202_v22 }
  0x98   : > { %v556_v62 = vrot.slane %v407_v58, %v1202_v22  ;;  %v458_v4 = vrot.slane %v386_v61, %v1202_v22  ;;  %v549_v6 = vcombine.high %v407_v58, %v407_v58  ;;  %v451_v11 = vcombine.high %v386_v61, %v386_v61 }
  0x99   : > { %v391_v0 = vsel %vm390_vm4, %v389_v60, %v388_v59  ;;  %v538_v12 = vcombine.high %v530_v9, %v530_v9  ;;  %v423_v29 = vcombine.high %v422_v56, %v422_v56 }
  0x9a   : > { %568 = vrot.lane.b32.xlu0 %v556_v62, %s1139_s20  ;;  %543 = vrot.lane.b32.xlu1 %v537_v63, %s1140_s21  ;;  %v393_v5 = vmul.bf16 %v391_v0, %v1213_v30  ;;  %v564_v7 = vcombine.low %v556_v62, %v556_v62  ;;  %v563_v13 = vrot.slane %v549_v6, %v1202_v22  ;;  %v516_v25 = vpop.permute.xlu0 %515  ;;  %v580_v31 = vpop.permute.xlu1 %579 }
  0x9b   : > { %v465_v16 = vrot.slane %v451_v11, %v1202_v22  ;;  %v466_v18 = vcombine.low %v458_v4, %v458_v4  ;;  %v521_v55 = vsel %vm519_vm7, %v516_v25, %v518_v26 }
  0x9c   : > { %v478_v10 = vcombine.low %v393_v5, %v393_v5  ;;  %v565_v15 = vcombine.low %v563_v13, %v563_v13  ;;  %v492_v20 = vrot.slane %v393_v5, %v1202_v22 }
  0x9d   : > { %v467_v19 = vcombine.low %v465_v16, %v465_v16 }
  0x9e   : > { %605 = vrot.lane.b32.xlu0 %v602_v3, %s1138_s19  ;;  %470 = vrot.lane.b32.xlu1 %v458_v4, %s1141_s22  ;;  %v485_v14 = vrot.slane %v478_v10, %v1202_v22  ;;  %v494_v21 = vcombine.low %v492_v20, %v492_v20  ;;  %v514_v30 = vpop.permute.xlu0 %513  ;;  %v578_v35 = vpop.permute.xlu1 %577 }
  0x9f   : > { %v520_v51 = vsel %vm519_vm7, %v514_v30, %v516_v25  ;;  %v584_v1 = vsel %vm583_vm11, %v578_v35, %v580_v31 }
  0xa0   : > { %v493_v23 = vcombine.low %v485_v14, %v485_v14 }
  0xa2   : > { %566 = vrot.lane.b32.xlu0 %v564_v7, %s1139_s20  ;;  %607 = vrot.lane.b32.xlu1 %v601_v8, %s1138_s19  ;;  %v582_v34 = vpop.permute.xlu0 %581  ;;  %v446_v37 = vpop.permute.xlu1 %445 }
  0xa3   : > { %v585_v63 = vsel %vm583_vm11, %v580_v31, %v582_v34 }
  0xa6   : > { %541 = vrot.lane.b32.xlu0 %v538_v12, %s1140_s21  ;;  %539 = vrot.lane.b32.xlu1 %v530_v9, %s1140_s21  ;;  %v444_v36 = vpop.permute.xlu0 %443 }
  0xa7   : > { %v449_v3 = vsel %vm1432_vm13, %v444_v36, %v446_v37 }
  0xa8   : > { %v618_v7 = vsel %vm612_vm6, %v423_v29, %v449_v3 }
  0xaa   : > { %497 = vrot.lane.b32.xlu0 %v485_v14, %s1143_s23  ;;  %570 = vrot.lane.b32.xlu1 %v565_v15, %s1139_s20  ;;  %v442_v38 = vpop.permute.xlu0 %441 }
  0xab   : > { %v448_v4 = vsel %vm1432_vm13, %v442_v38, %v444_v36  ;;  %vm708_vm13 = vcmask 273408  }
  0xac   : > { %v615_v8 = vsel %vm612_vm6, %v422_v56, %v448_v4  ;;  %709 = vst.msk [vmem:[#allocation2 + $0x8] sm:$0xf] %vm708_vm13, %v1142_v17  ;;  %vm725_vm13 = vcmask 1047556  }
  0xae   : > { %468 = vrot.lane.b32.xlu1 %v466_v18, %s1141_s22  ;;  %472 = vrot.lane.b32.xlu0 %v467_v19, %s1141_s22  ;;  %v647_v18 = vld [vmem:[%s1425_s1] sm:$0xf] }
  0xb2   : > { %499 = vrot.lane.b32.xlu1 %v494_v21, %s1143_s23  ;;  %495 = vrot.lane.b32.xlu0 %v493_v23, %s1143_s23 }
  0xb6   : > { %651 = vperm.xlu1 %1113, %v648_v24  }
  0xba   : > { %772 = vrot.lane.b32.xlu1 %v1207_v27, %s1130_s11 }
  0xbe   : > { %756 = vrot.lane.b32.xlu1 %v1207_v27, %s1131_s12  ;;  %s1085_s12 = sshll.u32 %s1442_s25, 4 }
  0xc2   : > { %748 = vrot.lane.b32.xlu1 %v1209_v28, %s1134_s15  ;;  %s278_s15 = scalar_lea.vmem %s1431_s7, %s1085_s12 }
 0x108   : > { %v604_v39 = vpop.permute.xlu1 %603 }
 0x10c   : > { %v569_v40 = vpop.permute.xlu0 %568  ;;  %v544_v41 = vpop.permute.xlu1 %543 }
 0x110   : > { %v606_v42 = vpop.permute.xlu0 %605  ;;  %v471_v43 = vpop.permute.xlu1 %470 }
 0x111   : > { %v610_v44 = vsel %vm609_vm5, %v604_v39, %v606_v42 }
 0x112   : > { %v659_v48 = vsel %vm612_vm6, %v610_v44, 0 }
 0x114   : > { %v567_v45 = vpop.permute.xlu0 %566  ;;  %v608_v46 = vpop.permute.xlu1 %607 }
 0x115   : > { %v611_v47 = vsel %vm609_vm5, %v606_v42, %v608_v46  ;;  %v573_v57 = vsel %vm572_vm9, %v567_v45, %v569_v40 }
 0x116   : > { %1056 = vmatprep.subr.msk.bf16.mxu0 %vm612_vm6, %v611_v47 }
 0x117   : > { %675 = vmatpush1.bf16.msra.mxu0 %v659_v48 }
 0x118   : > { %v542_v49 = vpop.permute.xlu0 %541  ;;  %v540_v50 = vpop.permute.xlu1 %539 }
 0x119   : > { %v546_v52 = vsel %vm545_vm8, %v540_v50, %v542_v49  ;;  %v547_v53 = vsel %vm545_vm8, %v542_v49, %v544_v41 }
 0x11a   : > { %v633_v54 = vsel %vm612_vm6, %v520_v51, %v546_v52  ;;  %v636_v60 = vsel %vm612_vm6, %v521_v55, %v547_v53  ;;  %vm654_vm6 = vcmask 293888  }
 0x11b   : > { %v638_v62 = vsel %vm619_vm10, %v633_v54, %v573_v57 }
 0x11c   : > { %v498_v58 = vpop.permute.xlu0 %497  ;;  %v571_v59 = vpop.permute.xlu1 %570  ;;  %v642_v2 = vsel %vm624_vm12, %v638_v62, %v584_v1 }
 0x11d   : > { %v574_v61 = vsel %vm572_vm9, %v569_v40, %v571_v59 }
 0x11e   : > { %v640_v0 = vsel %vm619_vm10, %v636_v60, %v574_v61 }
 0x11f   : > { %v645_v22 = vsel %vm624_vm12, %v640_v0, %v585_v63 }
 0x120   : > { %676 = vmatprep.subr.bf16.mxu0 %v645_v22  ;;  %v469_v32 = vpop.permute.xlu1 %468  ;;  %v473_v33 = vpop.permute.xlu0 %472 }
 0x121   : > { %677 = vmatpush1.bf16.msra.mxu0 %v642_v2  ;;  %v475_v5 = vsel %vm1434_vm14, %v469_v32, %v471_v43  ;;  %v476_v6 = vsel %vm1434_vm14, %v471_v43, %v473_v33 }
 0x122   : > { %v623_v13 = vsel %vm619_vm10, %v618_v7, %v476_v6  ;;  %v621_v14 = vsel %vm619_vm10, %v615_v8, %v475_v5 }
 0x124   : > { %v500_v9 = vpop.permute.xlu1 %499  ;;  %v496_v10 = vpop.permute.xlu0 %495 }
 0x125   : > { %v503_v11 = vsel %vm1433_vm15, %v498_v58, %v500_v9  ;;  %v502_v12 = vsel %vm1433_vm15, %v496_v10, %v498_v58  ;;  %vm728_vm15 = vcmask 134144  }
 0x126   : > { %v629_v15 = vsel %vm624_vm12, %v623_v13, %v503_v11  ;;  %v626_v16 = vsel %vm624_vm12, %v621_v14, %v502_v12  ;;  %vm724_vm12 = vcmask 1043592   ;;  %v930_v13 = vld [vmem:[%s1428_s4] sm:$0xff] }
 0x127   : > { %678 = vmatprep.subr.bf16.mxu0 %v629_v15  ;;  %vm726_vm14 = vmor %vm725_vm13, %vm724_vm12 }
 0x128   : > { %679 = vmatpush1.bf16.msra.mxu0 %v626_v16 }
 0x12b   : > { %1057 = vmatmul.mubr.msk.bf16.vlgmr.msra.gmra.mxu0 %vm654_vm6, %v647_v18  ;;  %vm720_vm6 = vcmask 138240  }
 0x131   : > { %v652_v19 = vpop.permute.xlu1 %651 }
 0x1eb   : > { %v698_v20 = vpop.f32.mrf.mxu0 }
 0x1ec   : > { %v699_v21 = vadd.f32 %v698_v20, %v652_v19 }
 0x1ed   : > { %v700_v23 = vpop.f32.mrf.mxu0 }
 0x1ee   : > { %v701_v24 = vadd.f32 %v700_v23, %v652_v19  ;;  %v705_v26 = vmax.f32 %v699_v21, 0.0 }
 0x1ef   : > { %v702_v25 = vpop.f32.mrf.mxu0 }
 0x1f0   : > { %v706_v30 = vmax.f32 %v701_v24, 0.0 }
 0x1f1   : > { %v703_v31 = vpop.f32.mrf.mxu0 }
 0x1f2   : > { %v1086_v34 = vpack.c.bf16 %v706_v30, %v705_v26 }
 0x1f4   : > { %717 = vrot.lane.b32.xlu0 %v1086_v34, %s1144_s30 }
 0x1f8   : > { %764 = vrot.lane.b32.xlu0 %v1209_v28, %s1132_s13 }
 0x1fc   : > { %740 = vrot.lane.b32.xlu0 %v1207_v27, %s1133_s14  ;;  %v773_v27 = vpop.permute.xlu1 %772 }
 0x1fd   : > { %v774_v41 = vrot.slane %v773_v27, 4 }
 0x1ff   : > { %v775_v46 = vsel %vm411_vm0, %v774_v41, %v773_v27  ;;  %vm1435_vm0 = vcmask 1031168  }
 0x200   : > { %v757_v47 = vpop.permute.xlu1 %756 }
 0x201   : > { %v758_v48 = vrot.slane %v757_v47, 4 }
 0x203   : > { %v759_v62 = vsel %vm397_vm1, %v758_v48, %v757_v47  ;;  %vm1436_vm1 = vcmask 916480  }
 0x204   : > { %v749_v63 = vpop.permute.xlu1 %748 }
 0x205   : > { %v750_v1 = vrot.slane %v749_v63, 4 }
 0x207   : > { %v751_v5 = vsel %vm390_vm4, %v750_v1, %v749_v63  ;;  %vm1439_vm4 = vcmask 1039360  }
 0x266   : > { %v718_v17 = vpop.permute.xlu0 %717 }
 0x267   : > { %v719_v35 = vrot.slane %v718_v17, 4 }
 0x269   : > { %v721_v36 = vsel %vm720_vm6, %v719_v35, %v718_v17  ;;  %729 = vst.msk [vmem:[#allocation2 + $0x8] sm:$0xf] %vm728_vm15, %v719_v35 }
 0x26a   : > { %727 = vst.msk [vmem:[#allocation2] sm:$0xff] %vm726_vm14, %v721_v36  ;;  %v765_v42 = vpop.permute.xlu0 %764 }
 0x26b   : > { %v766_v43 = vrot.slane %v765_v42, 4 }
 0x26d   : > { %v767_v53 = vsel %vm404_vm2, %v766_v43, %v765_v42  ;;  %vm1437_vm2 = vmmov %vm1436_vm1 }
 0x26e   : > { %v741_v50 = vpop.permute.xlu0 %740 }
 0x26f   : > { %v742_v54 = vrot.slane %v741_v50, 4 }
 0x270   : > { %v736_v37 = vld [vmem:[#allocation2 + $0x8] sm:$0xf] }
 0x271   : > { %v1338_v38 = vld [vmem:[#allocation2] sm:$0xff]  ;;  %v1340_v39 = vcombine.low %v736_v37, %v736_v37  ;;  %v779_v45 = vmul.bf16 %v774_v41, %v736_v37  ;;  %v771_v49 = vmul.bf16 %v766_v43, %v736_v37  ;;  %v763_v55 = vmul.bf16 %v758_v48, %v736_v37 }
 0x272   : > { %v1064_v40 = vcombine.high %v1338_v38, %v1338_v38  ;;  %v1063_v44 = vcombine.low %v1338_v38, %v1338_v38  ;;  %v778_v52 = vmul.bf16 %v775_v46, %v1338_v38  ;;  %v770_v56 = vmul.bf16 %v767_v53, %v1338_v38 }
 0x273   : > { %877 = vrot.lane.b32.xlu0 %v1340_v39, %s1136_s17  ;;  %v1080_v51 = vcombine.low %v779_v45, %v779_v45  ;;  %v1077_v57 = vcombine.low %v771_v49, %v771_v49  ;;  %v747_v59 = vmul.bf16 %v742_v54, %v736_v37  ;;  %v1074_v60 = vcombine.low %v763_v55, %v763_v55 }
 0x274   : > { %875 = vrot.lane.b32.xlu1 %v1064_v40, %s1136_s17  ;;  %v1079_v58 = vcombine.high %v778_v52, %v778_v52  ;;  %v1076_v61 = vcombine.high %v770_v56, %v770_v56  ;;  %v762_v0 = vmul.bf16 %v759_v62, %v1338_v38  ;;  %v1075_v29 = vcombine.low %v770_v56, %v770_v56 }
 0x275   : > { %v1068_v22 = vcombine.low %v747_v59, %v747_v59  ;;  %v743_v32 = vsel %vm383_vm3, %v742_v54, %v741_v50  ;;  %v755_v33 = vmul.bf16 %v750_v1, %v736_v37  ;;  %v1078_v3 = vcombine.low %v778_v52, %v778_v52  ;;  %vm1438_vm3 = vmmov %vm1435_vm0 }
 0x276   : > { %v746_v2 = vmul.bf16 %v743_v32, %v1338_v38  ;;  %v1073_v4 = vcombine.high %v762_v0, %v762_v0  ;;  %v754_v6 = vmul.bf16 %v751_v5, %v1338_v38  ;;  %v1072_v9 = vcombine.low %v762_v0, %v762_v0 }
 0x277   : > { %837 = vrot.lane.b32.xlu0 %v1340_v39, %s1135_s16  ;;  %v1071_v7 = vcombine.low %v755_v33, %v755_v33 }
 0x278   : > { %835 = vrot.lane.b32.xlu1 %v1064_v40, %s1135_s16  ;;  %v1067_v8 = vcombine.high %v746_v2, %v746_v2  ;;  %v1070_v10 = vcombine.high %v754_v6, %v754_v6  ;;  %v1069_v11 = vcombine.low %v754_v6, %v754_v6  ;;  %v1066_v12 = vcombine.low %v746_v2, %v746_v2 }
 0x27b   : > { %873 = vrot.lane.b32.xlu0 %v1063_v44, %s1136_s17 }
 0x27c   : > { %833 = vrot.lane.b32.xlu1 %v1063_v44, %s1135_s16 }
 0x27f   : > { %893 = vrot.lane.b32.xlu0 %v1080_v51, %s1138_s19 }
 0x280   : > { %795 = vrot.lane.b32.xlu1 %v1064_v40, %s1137_s18 }
 0x283   : > { %869 = vrot.lane.b32.xlu0 %v1077_v57, %s1139_s20 }
 0x284   : > { %891 = vrot.lane.b32.xlu1 %v1079_v58, %s1138_s19 }
 0x287   : > { %853 = vrot.lane.b32.xlu0 %v1074_v60, %s1140_s21  ;;  %v735_v60 = vmul.bf16 %v1338_v38, %v1209_v28  ;;  %v929_v38 = vld [vmem:[%s1427_s3] sm:$0xf] }
 0x288   : > { %867 = vrot.lane.b32.xlu1 %v1076_v61, %s1139_s20 }
 0x28b   : > { %813 = vrot.lane.b32.xlu0 %v1068_v22, %s1141_s22  ;;  %v1062_v22 = vcombine.high %v735_v60, %v735_v60 }
 0x28c   : > { %865 = vrot.lane.b32.xlu1 %v1075_v29, %s1139_s20  ;;  %v1061_v29 = vcombine.low %v735_v60, %v735_v60 }
 0x28f   : > { %889 = vrot.lane.b32.xlu0 %v1078_v3, %s1138_s19 }
 0x290   : > { %851 = vrot.lane.b32.xlu1 %v1073_v4, %s1140_s21 }
 0x293   : > { %829 = vrot.lane.b32.xlu0 %v1071_v7, %s1143_s23 }
 0x294   : > { %811 = vrot.lane.b32.xlu1 %v1067_v8, %s1141_s22 }
 0x297   : > { %849 = vrot.lane.b32.xlu0 %v1072_v9, %s1140_s21 }
 0x298   : > { %827 = vrot.lane.b32.xlu1 %v1070_v10, %s1143_s23 }
 0x29b   : > { %825 = vrot.lane.b32.xlu0 %v1069_v11, %s1143_s23 }
 0x29c   : > { %809 = vrot.lane.b32.xlu1 %v1066_v12, %s1141_s22 }
 0x29f   : > { %797 = vrot.lane.b32.xlu0 %v1340_v39, %s1137_s18 }
 0x2a0   : > { %793 = vrot.lane.b32.xlu1 %v1063_v44, %s1137_s18 }
 0x2a3   : > { %933 = vperm.xlu0 %1114, %v930_v13  }
 0x2e5   : > { %v878_v14 = vpop.permute.xlu0 %877 }
 0x2e6   : > { %v876_v15 = vpop.permute.xlu1 %875 }
 0x2e7   : > { %v880_v40 = vsel %vm583_vm11, %v876_v15, %v878_v14 }
 0x2e9   : > { %v838_v16 = vpop.permute.xlu0 %837 }
 0x2ea   : > { %v836_v18 = vpop.permute.xlu1 %835 }
 0x2eb   : > { %v840_v47 = vsel %vm519_vm7, %v836_v18, %v838_v16 }
 0x2ed   : > { %v874_v19 = vpop.permute.xlu0 %873 }
 0x2ee   : > { %v834_v20 = vpop.permute.xlu1 %833  ;;  %v879_v46 = vsel %vm583_vm11, %v874_v19, %v876_v15 }
 0x2ef   : > { %v839_v52 = vsel %vm519_vm7, %v834_v20, %v836_v18  ;;  %vm936_vm7 = vcmask 588800  }
 0x2f1   : > { %v894_v21 = vpop.permute.xlu0 %893 }
 0x2f2   : > { %v796_v23 = vpop.permute.xlu1 %795 }
 0x2f5   : > { %v870_v24 = vpop.permute.xlu0 %869 }
 0x2f6   : > { %v892_v25 = vpop.permute.xlu1 %891 }
 0x2f7   : > { %v896_v26 = vsel %vm609_vm5, %v892_v25, %v894_v21 }
 0x2f8   : > { %1081 = vmatprep.subr.msk.bf16.mxu1 %vm619_vm10, %v896_v26 }
 0x2f9   : > { %v854_v30 = vpop.permute.xlu0 %853 }
 0x2fa   : > { %v868_v31 = vpop.permute.xlu1 %867 }
 0x2fb   : > { %v872_v35 = vsel %vm572_vm9, %v868_v31, %v870_v24 }
 0x2fc   : > { %v927_v42 = vsel %vm619_vm10, %v872_v35, %v880_v40 }
 0x2fd   : > { %v814_v34 = vpop.permute.xlu0 %813 }
 0x2fe   : > { %v866_v17 = vpop.permute.xlu1 %865 }
 0x2ff   : > { %v871_v41 = vsel %vm572_vm9, %v866_v17, %v868_v31 }
 0x300   : > { %v923_v48 = vsel %vm619_vm10, %v871_v41, %v879_v46 }
 0x301   : > { %v890_v36 = vpop.permute.xlu0 %889 }
 0x302   : > { %v852_v37 = vpop.permute.xlu1 %851  ;;  %v895_v39 = vsel %vm609_vm5, %v890_v36, %v892_v25  ;;  %vm1440_vm5 = vmmov %vm1439_vm4 }
 0x303   : > { %v941_v27 = vsel %vm619_vm10, %v895_v39, 0  ;;  %v856_v43 = vsel %vm545_vm8, %v852_v37, %v854_v30 }
 0x304   : > { %953 = vmatpush1.bf16.msra.mxu1 %v941_v27  ;;  %v919_v49 = vsel %vm619_vm10, %v840_v47, %v856_v43 }
 0x305   : > { %954 = vmatprep.subr.bf16.mxu1 %v927_v42  ;;  %v830_v44 = vpop.permute.xlu0 %829 }
 0x306   : > { %v812_v45 = vpop.permute.xlu1 %811 }
 0x307   : > { %v816_v53 = vsel %vm1435_vm0, %v812_v45, %v814_v34 }
 0x308   : > { %955 = vmatpush1.bf16.msra.mxu1 %v923_v48 }
 0x309   : > { %956 = vmatprep.subr.bf16.mxu1 %v919_v49  ;;  %v850_v50 = vpop.permute.xlu0 %849 }
 0x30a   : > { %v828_v51 = vpop.permute.xlu1 %827  ;;  %v855_v54 = vsel %vm545_vm8, %v850_v50, %v852_v37 }
 0x30b   : > { %v832_v55 = vsel %vm1436_vm1, %v828_v51, %v830_v44  ;;  %v915_v56 = vsel %vm619_vm10, %v839_v52, %v855_v54 }
 0x30c   : > { %v911_v57 = vsel %vm619_vm10, %v816_v53, %v832_v55  ;;  %957 = vmatpush1.bf16.msra.mxu1 %v915_v56 }
 0x30d   : > { %958 = vmatprep.subr.bf16.mxu1 %v911_v57  ;;  %v826_v58 = vpop.permute.xlu0 %825 }
 0x30e   : > { %v810_v59 = vpop.permute.xlu1 %809  ;;  %v831_v61 = vsel %vm1437_vm2, %v826_v58, %v828_v51 }
 0x30f   : > { %v815_v62 = vsel %vm1438_vm3, %v810_v59, %v812_v45 }
 0x310   : > { %v907_v63 = vsel %vm619_vm10, %v815_v62, %v831_v61 }
 0x311   : > { %959 = vmatpush1.bf16.msra.mxu1 %v907_v63  ;;  %v798_v0 = vpop.permute.xlu0 %797 }
 0x312   : > { %v794_v1 = vpop.permute.xlu1 %793  ;;  %v800_v32 = vsel %vm1439_vm4, %v796_v23, %v798_v0 }
 0x313   : > { %v799_v33 = vsel %vm1440_vm5, %v794_v1, %v796_v23  ;;  %v903_v2 = vsel %vm619_vm10, %v1062_v22, %v800_v32 }
 0x314   : > { %v899_v28 = vsel %vm619_vm10, %v1061_v29, %v799_v33  ;;  %960 = vmatprep.subr.bf16.mxu1 %v903_v2 }
 0x315   : > { %961 = vmatpush1.bf16.msra.mxu1 %v899_v28 }
 0x318   : > { %1082 = vmatmul.mubr.msk.bf16.vlgmr.msra.gmra.mxu1 %vm936_vm7, %v929_v38 }
 0x31e   : > { %v934_v3 = vpop.permute.xlu0 %933 }
 0x3d8   : > { %v980_v4 = vpop.f32.mrf.mxu1 }
 0x3d9   : > { %v981_v5 = vadd.f32 %v980_v4, %v934_v3 }
 0x3da   : > { %v982_v6 = vpop.f32.mrf.mxu1 }
 0x3db   : > { %v987_v7 = vmax.f32 %v981_v5, 0.0  ;;  %v983_v8 = vadd.f32 %v982_v6, %v934_v3 }
 0x3dc   : > { %v984_v9 = vpop.f32.mrf.mxu1 }
 0x3dd   : > { %989 = vst [vmem:[%s278_s15] sm:$0xff] %v987_v7  ;;  %v988_v10 = vmax.f32 %v983_v8, 0.0 }
 0x3de   : > { %v985_v11 = vpop.f32.mrf.mxu1 }
 0x3df   : > { %990 = vst [vmem:[%s278_s15 + $0x8] sm:$0xff] %v988_v10 }
 0x3e0 PF: > { %s17_s24 = sadd.s32 1, %s1126_s24  }
 0x3e1   : > { %p14_p4 = scmp.ge.s32.totalorder %s17_s24, 4  }
 0x3e3   :  { %16 = sbr.rel (!%p14_p4) target bundleno = 1 (0x1), region = 78 }

</bundles_post_ra>
